<compile_context>
chip_gen: v7x
topology: tpu7x:2x2x1
jax: 0.10.0
libtpu: 0.0.40
codegen_flags: <defaults>
</compile_context>

<pallas_src>
import functools

import jax
import jax.numpy as jnp
from jax.experimental import pallas as pl
from jax.experimental.pallas import tpu as pltpu

# Tunables (bytes).
_TILE_TARGET_BYTES = 2 << 20      # aim for ~2 MiB input tiles (amortize grid overhead)
_SLAB_BUDGET_BYTES = 4 << 20      # above this, tile the permuted block itself
_DMA_PLANE_MIN_BYTES = 128 << 10  # min contiguous plane for the copy-only fast path
_LANE_BYTES = 512                 # 128 f32 lanes; below this a store is "narrow"


def _prod(xs):
    out = 1
    for v in xs:
        out *= int(v)
    return out


def _coalesce(shape, order):
    """Merge input axes that remain adjacent and in-order in the output."""
    groups = [[order[0]]]
    for a in order[1:]:
        if a == groups[-1][-1] + 1:
            groups[-1].append(a)
        else:
            groups.append([a])
    by_input = sorted(range(len(groups)), key=lambda g: groups[g][0])
    new_axis = {g: i for i, g in enumerate(by_input)}
    cshape = tuple(_prod(shape[a] for a in groups[g]) for g in by_input)
    corder = tuple(new_axis[g] for g in range(len(groups)))
    return cshape, corder


def _largest_divisor_at_most(n, cap):
    cap = max(1, min(n, cap))
    best, d = 1, 1
    while d * d <= n:
        if n % d == 0:
            if d <= cap:
                best = max(best, d)
            if (n // d) <= cap:
                best = max(best, n // d)
        d += 1
    return best


def _vmem_limit(tile_bytes):
    # in + out, double-buffered, plus headroom; stays below v7x's 64 MiB VMEM.
    return int(min(56 << 20, max(32 << 20, 4 * tile_bytes + (4 << 20))))


# ----------------------------- kernels --------------------------------------


def _copy_kernel(x_ref, o_ref):
    # DMA-only relayout: the permutation is entirely in the BlockSpec index_maps.
    o_ref[...] = x_ref[...]


def _transpose_kernel(x_ref, o_ref, *, perm):
    o_ref[...] = jnp.transpose(x_ref[...], perm)


def _transpose_flatten_kernel(x_ref, o_ref, *, perm):
    # Reorder the VMEM tile, then store it as one lane-dense flat slab so the
    # write-back is unmasked full-lane vst + one wide DMA per tile.
    o_ref[...] = jnp.transpose(x_ref[...], perm).reshape(o_ref.shape)


# ------------------------------ paths ----------------------------------------


def _permute_copy_only(x, order, out_shape, s, itemsize):
    """Trailing `s` (>=2) axes unchanged: pure relayout of the leading axes via
    grid + index_maps, identity copy in the kernel (no in-VMEM transpose)."""
    ndim = x.ndim
    k_lead = ndim - s
    plane = tuple(x.shape[k_lead:])
    inv = [order.index(a) for a in range(k_lead)]  # input lead axis -> grid pos

    # If one plane is too big for VMEM double-buffering, also tile its
    # second-to-last dim (same position in input and output, so the kernel
    # stays a plain copy and the block keeps a full, lane-dense last dim).
    sub_mult = max(8, 8 * (4 // max(1, itemsize)))     # sublane tile for dtype
    row_group = _prod(plane[:-2]) * plane[-1] * itemsize
    t_full = plane[-2]
    t0 = t_full
    if _prod(plane) * itemsize > _SLAB_BUDGET_BYTES:
        t0 = max(sub_mult, (_SLAB_BUDGET_BYTES // max(1, row_group)) // sub_mult * sub_mult)
        t0 = min(t0, t_full)
    n_chunks = pl.cdiv(t_full, t0)

    blk = (1,) * k_lead + plane[:-2] + (t0, plane[-1])
    grid = tuple(out_shape[:k_lead]) + (n_chunks,)

    def in_index(*g):
        return tuple(g[inv[a]] for a in range(k_lead)) + (0,) * (s - 2) + (g[k_lead], 0)

    def out_index(*g):
        return tuple(g[:k_lead]) + (0,) * (s - 2) + (g[k_lead], 0)

    tile_bytes = _prod(blk) * itemsize
    return pl.pallas_call(
        _copy_kernel,
        out_shape=jax.ShapeDtypeStruct(out_shape, x.dtype),
        grid_spec=pltpu.PrefetchScalarGridSpec(
            num_scalar_prefetch=0,
            grid=grid,
            in_specs=[pl.BlockSpec(blk, in_index)],
            out_specs=pl.BlockSpec(blk, out_index),
        ),
        compiler_params=pltpu.CompilerParams(
            dimension_semantics=("parallel",) * len(grid),
            vmem_limit_bytes=_vmem_limit(tile_bytes),
        ),
    )(x)


def _permute_batched(x, out_shape, batch, rest_in, q, rest_out, r_total,
                     slab_bytes, itemsize):
    """Common path: batch the identity prefix, transpose the coalesced rest in
    VMEM, store lane-dense when the natural output last dim is narrow."""
    m = len(rest_in)
    nb = _largest_divisor_at_most(batch, max(1, _TILE_TARGET_BYTES // max(1, slab_bytes)))
    g_steps = batch // nb
    x2 = x.reshape((g_steps, nb) + rest_in)
    perm = (0, 1) + tuple(2 + j for j in q)
    tile_bytes = nb * slab_bytes

    in_spec = pl.BlockSpec((1, nb) + rest_in, lambda g: (g,) + (0,) * (m + 1))
    params = pltpu.CompilerParams(
        dimension_semantics=("parallel",),
        vmem_limit_bytes=_vmem_limit(tile_bytes),
    )

    if rest_out[-1] * itemsize < _LANE_BYTES:
        # Narrow natural last dim (e.g. NHWC with C=4): flatten the permuted
        # block to a single lane-dense row of length prod(rest).
        try:
            out2 = pl.pallas_call(
                functools.partial(_transpose_flatten_kernel, perm=perm),
                out_shape=jax.ShapeDtypeStruct((g_steps, nb, r_total), x.dtype),
                grid_spec=pltpu.PrefetchScalarGridSpec(
                    num_scalar_prefetch=0,
                    grid=(g_steps,),
                    in_specs=[in_spec],
                    out_specs=pl.BlockSpec((1, nb, r_total), lambda g: (g, 0, 0)),
                ),
                compiler_params=params,
            )(x2)
            return jax.block_until_ready(out2).reshape(out_shape)
        except Exception:
            # Mosaic could not lower the in-kernel flatten for this shape/dtype;
            # fall back to the (correct, but narrower-store) variant below.
            pass

    out2 = pl.pallas_call(
        functools.partial(_transpose_kernel, perm=perm),
        out_shape=jax.ShapeDtypeStruct((g_steps, nb) + rest_out, x.dtype),
        grid_spec=pltpu.PrefetchScalarGridSpec(
            num_scalar_prefetch=0,
            grid=(g_steps,),
            in_specs=[in_spec],
            out_specs=pl.BlockSpec((1, nb) + rest_out,
                                   lambda g: (g,) + (0,) * (m + 1)),
        ),
        compiler_params=params,
    )(x2)
    return out2.reshape(out_shape)


def _permute_tiled_slab(x, out_shape, batch, rest_in, q, rest_out, itemsize):
    """One permuted slab is too big for a single VMEM tile: tile it along the
    leading *output* axis with an extra (parallel) grid dimension."""
    m = len(rest_in)
    a = q[0]                       # input axis that becomes the leading output axis
    a_size = rest_in[a]
    row_bytes = _prod(rest_out[1:]) * itemsize
    sub_mult = max(8, 8 * (4 // max(1, itemsize)))
    if a == m - 1:
        mult = 128                  # chunk lands on the lane dim of the input block
    elif a == m - 2 or m == 2:
        mult = sub_mult             # chunk lands on a sublane dim
    else:
        mult = 1
    t0 = max(mult, (_SLAB_BUDGET_BYTES // max(1, row_bytes)) // mult * mult)
    t0 = min(t0, a_size)            # t0 == a_size (full) is always legal
    n_chunks = pl.cdiv(a_size, t0)

    x2 = x.reshape((batch,) + rest_in)
    in_blk = (1,) + tuple(t0 if j == a else rest_in[j] for j in range(m))
    out_blk = (1, t0) + rest_out[1:]
    perm = (0,) + tuple(1 + j for j in q)
    tile_bytes = _prod(in_blk) * itemsize

    out2 = pl.pallas_call(
        functools.partial(_transpose_kernel, perm=perm),
        out_shape=jax.ShapeDtypeStruct((batch,) + rest_out, x.dtype),
        grid_spec=pltpu.PrefetchScalarGridSpec(
            num_scalar_prefetch=0,
            grid=(batch, n_chunks),
            in_specs=[pl.BlockSpec(
                in_blk,
                lambda b, c: (b,) + tuple(c if j == a else 0 for j in range(m)))],
            out_specs=pl.BlockSpec(out_blk, lambda b, c: (b, c) + (0,) * (m - 1)),
        ),
        compiler_params=pltpu.CompilerParams(
            dimension_semantics=("parallel", "parallel"),
            vmem_limit_bytes=_vmem_limit(tile_bytes),
        ),
    )(x2)
    return out2.reshape(out_shape)


# ------------------------------ wrapper ---------------------------------------


def permute(x, order):
    """Pallas equivalent of torch `x.permute(*order)` (pure axis permutation)."""
    order = tuple(int(a) for a in order)
    ndim = x.ndim
    assert sorted(order) == list(range(ndim)), "order must be a permutation"
    if order == tuple(range(ndim)):
        return x
    out_shape = tuple(x.shape[a] for a in order)
    itemsize = jnp.dtype(x.dtype).itemsize

    # --- DMA-only fast path: trailing >=2 axes unchanged, big contiguous planes.
    s = 0
    while s < ndim and order[ndim - 1 - s] == ndim - 1 - s:
        s += 1
    if s >= 2 and _prod(x.shape[ndim - s:]) * itemsize >= _DMA_PLANE_MIN_BYTES:
        return _permute_copy_only(x, order, out_shape, s, itemsize)

    # --- General path: coalesce axes, batch the identity prefix, transpose in VMEM.
    cshape, corder = _coalesce(x.shape, order)
    k = len(cshape)
    p = 0
    while p < k and corder[p] == p:
        p += 1
    batch = _prod(cshape[:p]) if p else 1
    rest_in = cshape[p:]
    q = tuple(c - p for c in corder[p:])        # permutation of the non-prefix axes
    rest_out = tuple(rest_in[j] for j in q)
    r_total = _prod(rest_in)
    slab_bytes = r_total * itemsize

    if slab_bytes > _SLAB_BUDGET_BYTES:
        return _permute_tiled_slab(x, out_shape, batch, rest_in, q, rest_out, itemsize)
    return _permute_batched(x, out_shape, batch, rest_in, q, rest_out, r_total,
                            slab_bytes, itemsize)


# ------------------------------ self-test -------------------------------------


def _check(x, order):
    out = jax.block_until_ready(permute(x, order))
    ref = jnp.transpose(x, order)
    assert out.shape == ref.shape, (order, out.shape, ref.shape)
    assert out.dtype == ref.dtype, (order, out.dtype, ref.dtype)
    assert bool(jnp.array_equal(out, ref)), f"permute mismatch for order={order}"


if __name__ == "__main__":
    key = jax.random.PRNGKey(0)
    k1, k2 = jax.random.split(key, 2)

    # Primary case (the module's typical use): NCHW -> NHWC.
    x = jax.random.normal(k1, (2, 4, 16, 16), dtype=jnp.float32)
    _check(x, (0, 2, 3, 1))

    # Other permutation classes (exercise the different kernel paths).
    _check(x, (0, 1, 3, 2))                     # spatial transpose, batched prefix
    _check(x, (2, 3, 0, 1))                     # no identity prefix
    _check(x, (0, 1, 2, 3))                     # identity
    _check(x.astype(jnp.bfloat16), (0, 2, 3, 1))  # sub-32-bit dtype

    # Trailing axes unchanged + large contiguous plane -> DMA-only copy path.
    y = jax.random.normal(k2, (3, 2, 256, 128), dtype=jnp.float32)
    _check(y, (1, 0, 2, 3))

    print("KERNEL_OK")
</pallas_src>

<mosaic_0001>
module attributes {stable_mosaic.version = 11 : i64} {
  func.func @_transpose_flatten_kernel(%arg0: i32, %arg1: memref<1x2x4x256xf32, #tpu.memory_space<vmem>>, %arg2: memref<1x2x1024xf32, #tpu.memory_space<vmem>>) attributes {dimension_semantics = [#tpu.dimension_semantics<parallel>], iteration_bounds = array<i64: 1>, scalar_prefetch = 0 : i64, scratch_operands = 0 : i64, tpu.core_type = #tpu.core_type<tc>, window_params = [{transform_indices = @transform_0, window_bounds = array<i64: 1, 2, 4, 256>}, {transform_indices = @transform_1, window_bounds = array<i64: 1, 2, 1024>}]} {
    %c0 = arith.constant 0 : index
    %c0_0 = arith.constant 0 : index
    %c0_1 = arith.constant 0 : index
    %c0_2 = arith.constant 0 : index
    %0 = vector.load %arg1[%c0, %c0_0, %c0_1, %c0_2] : memref<1x2x4x256xf32, #tpu.memory_space<vmem>>, vector<1x2x4x256xf32>
    %1 = tpu.transpose %0, [0, 1, 3, 2] : vector<1x2x4x256xf32> -> vector<1x2x256x4xf32>
    %2 = vector.shape_cast %1 : vector<1x2x256x4xf32> to vector<1x2x1024xf32>
    %c0_3 = arith.constant 0 : index
    %c0_4 = arith.constant 0 : index
    %c0_5 = arith.constant 0 : index
    %3 = vector.load %arg2[%c0_3, %c0_4, %c0_5] : memref<1x2x1024xf32, #tpu.memory_space<vmem>>, vector<1x2x1024xf32>
    tpu.vector_store %arg2[%c0_3, %c0_4, %c0_5], %2 {strides = array<i32>} : memref<1x2x1024xf32, #tpu.memory_space<vmem>>, vector<1x2x1024xf32>,
    return
  }
  func.func @transform_0(%arg0: i32) -> (i32, i32, i32, i32) {
    %c0_i32 = arith.constant 0 : i32
    %c0_i32_0 = arith.constant 0 : i32
    %c0_i32_1 = arith.constant 0 : i32
    %c0_i32_2 = arith.constant 0 : i32
    return %arg0, %c0_i32, %c0_i32_0, %c0_i32_1 : i32, i32, i32, i32
  }
  func.func @transform_1(%arg0: i32) -> (i32, i32, i32) {
    %c0_i32 = arith.constant 0 : i32
    %c0_i32_0 = arith.constant 0 : i32
    %c0_i32_1 = arith.constant 0 : i32
    return %arg0, %c0_i32, %c0_i32_0 : i32, i32, i32
  }
}

module attributes {stable_mosaic.version = 11 : i64} {
  func.func @_transpose_kernel(%arg0: i32, %arg1: memref<1x2x4x256xf32, #tpu.memory_space<vmem>>, %arg2: memref<1x2x256x4xf32, #tpu.memory_space<vmem>>) attributes {dimension_semantics = [#tpu.dimension_semantics<parallel>], iteration_bounds = array<i64: 1>, scalar_prefetch = 0 : i64, scratch_operands = 0 : i64, tpu.core_type = #tpu.core_type<tc>, window_params = [{transform_indices = @transform_0, window_bounds = array<i64: 1, 2, 4, 256>}, {transform_indices = @transform_1, window_bounds = array<i64: 1, 2, 256, 4>}]} {
    %c0 = arith.constant 0 : index
    %c0_0 = arith.constant 0 : index
    %c0_1 = arith.constant 0 : index
    %c0_2 = arith.constant 0 : index
    %0 = vector.load %arg1[%c0, %c0_0, %c0_1, %c0_2] : memref<1x2x4x256xf32, #tpu.memory_space<vmem>>, vector<1x2x4x256xf32>
    %1 = tpu.transpose %0, [0, 1, 3, 2] : vector<1x2x4x256xf32> -> vector<1x2x256x4xf32>
    %c0_3 = arith.constant 0 : index
    %c0_4 = arith.constant 0 : index
    %c0_5 = arith.constant 0 : index
    %c0_6 = arith.constant 0 : index
    %2 = vector.load %arg2[%c0_3, %c0_4, %c0_5, %c0_6] : memref<1x2x256x4xf32, #tpu.memory_space<vmem>>, vector<1x2x256x4xf32>
    tpu.vector_store %arg2[%c0_3, %c0_4, %c0_5, %c0_6], %1 {strides = array<i32>} : memref<1x2x256x4xf32, #tpu.memory_space<vmem>>, vector<1x2x256x4xf32>,
    return
  }
  func.func @transform_0(%arg0: i32) -> (i32, i32, i32, i32) {
    %c0_i32 = arith.constant 0 : i32
    %c0_i32_0 = arith.constant 0 : i32
    %c0_i32_1 = arith.constant 0 : i32
    %c0_i32_2 = arith.constant 0 : i32
    return %arg0, %c0_i32, %c0_i32_0, %c0_i32_1 : i32, i32, i32, i32
  }
  func.func @transform_1(%arg0: i32) -> (i32, i32, i32, i32) {
    %c0_i32 = arith.constant 0 : i32
    %c0_i32_0 = arith.constant 0 : i32
    %c0_i32_1 = arith.constant 0 : i32
    %c0_i32_2 = arith.constant 0 : i32
    return %arg0, %c0_i32, %c0_i32_0, %c0_i32_1 : i32, i32, i32, i32
  }
}

</mosaic_0001>

<bundles_post_ra>
// kernel: tpu_custom_call.1
= control target key start
LH: loop header
LB: loop body
LE: loop exit
PB: predicated region body
PF: predicated region fallthrough
CT: control target
= control target key end

     0   :  { %6 = vsyncpa [#allocation3], 0  ;;  %s5294_s0 = inlined_call_operand.hbm [shape: f32[1,2,4,256], index: 0, kind: input, shape index: {}]   ;;  %s5295_s1 = inlined_call_operand.hbm [shape: f32[1,2,1024], index: 1, kind: output, shape index: {}]  }
   0x1   :  { %7 = vsyncpa [#allocation4], 0  ;;  %s3690_s6 = smov [#allocation2]   ;;  %s3642_s10 = scalar_lea.hbm %s5294_s0, 256 }
   0x2   :  { %s13_s7 = sshll.u32 %s3690_s6, 4  ;;  %p3643_p0 = scmp.ne.s32.totalorder %s5294_s0, %s3642_s10  ;;  %s14_s7 = int_to_ptr.vmem [resolvable:$true] %s13_s7 }
   0x3   :  { %p3646_p1 = scmp.lt.u32.totalorder %s3642_s10, %s5294_s0 }
   0x5   :  { %p3648_p2 = pnand %p3646_p1, %p3643_p0 }
   0x7   :  { %3651 = shalt.err (!%p3648_p2)
}
   0x8   :  { %s3652_s15 = scalar_lea.vmem %s14_s7, 256  ;;  %p3657_p4 = scmp.lt.s32.totalorder %s14_s7, %s14_s7 }
   0x9   :  { %p3653_p3 = scmp.ne.s32.totalorder %s14_s7, %s3652_s15  ;;  %p3658_p5 = scmp.lt.s32.totalorder %s3652_s15, %s3652_s15 }
   0xb   :  { %p3659_p6 = por %p3658_p5, %p3657_p4 }
   0xd   :  { %p3660_p7 = pnand %p3659_p6, %p3653_p3 }
   0xf   :  { %3663 = shalt.err (!%p3660_p7)
}
  0x10   :  { %s3691_s16 = smov 128   ;;  %s3692_s17 = smov 8  }
  0x11   :  { %19 = dma.hbm_to_vmem [thread:$0]  %s5294_s0, 256, %s14_s7, [#allocation3], %s3691_s16, %s3691_s16, %s3692_s17  }
  0x12   :  { %3686 = dma.done.wait [#allocation3], 256  }
  0x13   :  { %3687 = vsyncadd [#allocation3], 4294967040  ;;  %v24_v0 = vld [vmem:[#allocation2 + $0x8] sm:$0xff]  ;;  %v23_v1 = vld [vmem:[#allocation2] sm:$0xff]  ;;  %v3693_v6 = vmov 1983009808   ;;  %v163_v8 = vlaneseq }
  0x14   :  { %95 = vxpose.xlu1.b32.start.end [1/1] (short) %v24_v0, 128  ;;  %31 = vxpose.xlu0.b32.start.end [1/1] (short) %v23_v1, 128  ;;  %v28_v2 = vcombine.high %v24_v0, %v24_v0  ;;  %v27_v3 = vcombine.high %v23_v1, %v23_v1  ;;  %v161_v7 = vunpack.c.l.s4 %v3693_v6  ;;  %v3694_v16 = vmov 1934713408   ;;  %s3696_s0 = smov 12   ;;  %s3697_s20 = smov 16  }
  0x15   :  { %v164_v12 = vshrl.u32 %v163_v8, 7  ;;  %v192_v17 = vunpack.c.l.s4 %v3694_v16  ;;  %v3695_v25 = vmov 0.0   ;;  %s3698_s21 = smov 4   ;;  %s3699_s22 = smov 20   ;;  %vm3263_vm0 = vcmask 31744  }
  0x16   :  { %v162_v11 = vunpack.c.0.s8 %v161_v7  ;;  %s3700_s23 = smov 24   ;;  %s3701_s24 = smov 28   ;;  %vm3265_vm1 = vcmask 64512   ;;  %vm3267_vm2 = vcmask 97280   ;;  %vm3269_vm3 = vcmask 130048  }
  0x17   :  { %v193_v22 = vunpack.c.0.s8 %v192_v17  ;;  %s3702_s25 = smov 32   ;;  %s3703_s26 = smov 36   ;;  %vm3271_vm4 = vcmask 162816   ;;  %vm3273_vm5 = vcmask 195584   ;;  %vm5349_vm6 = vcmask 228352  }
  0x18   :  { %v3754_v15 = vsub.s32 %v162_v11, %v164_v12  ;;  %s3704_s27 = smov 40   ;;  %s3705_s28 = smov 44   ;;  %vm5344_vm7 = vcmask 261120   ;;  %vm5346_vm8 = vcmask 293888   ;;  %vm5345_vm9 = vcmask 326656  }
  0x19   :  { %v3768_v29 = vsub.s32 %v193_v22, %v164_v12  ;;  %s3706_s29 = smov 48   ;;  %s3707_s30 = smov 52   ;;  %vm5327_vm10 = vcmask 359424   ;;  %vm5329_vm11 = vcmask 392192   ;;  %vm5328_vm12 = vcmask 424960  }
  0x1a   :  { %s5333_s2 = smov 56   ;;  %s5325_s3 = smov 60   ;;  %vm5331_vm13 = vcmask 457728   ;;  %vm5330_vm14 = vcmask 490496   ;;  %vm5337_vm15 = vcmask 523264  }
  0x1b   :  { %s3710_s4 = smov 64   ;;  %s3711_s5 = smov 68  }
  0x1c   :  { %s5322_s6 = smov 72   ;;  %s3713_s7 = smov 76  }
  0x1d   :  { %s3714_s8 = smov 80   ;;  %s5318_s9 = smov 84  }
  0x1e   :  { %s3716_s10 = smov 88   ;;  %s3717_s11 = smov 92  }
  0x1f   :  { %s5301_s12 = smov 96   ;;  %s3719_s13 = smov 100  }
  0x20   :  { %s3720_s14 = smov 104   ;;  %s3721_s15 = smov 108  }
  0x21   :  { %s5296_s16 = smov 112   ;;  %s3723_s18 = smov 116  }
  0x22   :  { %s3724_s19 = smov 120  }
  0x51   :  { %127 = vxpose.xlu1.b32.start.end [1/1] (short) %v28_v2, 128  ;;  %63 = vxpose.xlu0.b32.start.end [1/1] (short) %v27_v3, 128 }
  0x94   :  { %v111_v4 = vpop.trf.xlu1  ;;  %v47_v5 = vpop.trf.xlu0 }
  0x95   :  { %v181_v20 = vrot.slane %v111_v4, %v3754_v15  ;;  %v166_v21 = vrot.slane %v47_v5, %v3754_v15  ;;  %v174_v26 = vcombine.high %v111_v4, %v3695_v25  ;;  %v159_v27 = vcombine.high %v47_v5, %v3695_v25 }
  0x97   :  { %v190_v28 = vcombine.high %v166_v21, %v181_v20  ;;  %v188_v32 = vrot.slane %v174_v26, %v3754_v15  ;;  %v173_v33 = vrot.slane %v159_v27, %v3754_v15  ;;  %v189_v35 = vcombine.low %v166_v21, %v181_v20 }
  0x98   :  { %v112_v9 = vpop.trf.xlu1  ;;  %v48_v10 = vpop.trf.xlu0 }
  0x99   :  { %v204_v34 = vrot.slane %v190_v28, %v3768_v29  ;;  %v205_v39 = vcombine.low %v173_v33, %v188_v32  ;;  %v3785_v40 = vrot.slane %v189_v35, %v3768_v29  ;;  %v247_v43 = vrot.slane %v112_v9, %v3754_v15 }
  0x9a   :  { %v232_v44 = vrot.slane %v48_v10, %v3754_v15  ;;  %v206_v46 = vcombine.high %v173_v33, %v188_v32  ;;  %v240_v47 = vcombine.high %v112_v9, %v3695_v25  ;;  %v225_v51 = vcombine.high %v48_v10, %v3695_v25 }
  0x9b   :  { %v222_v38 = vcombine.high %v204_v34, %v3695_v25  ;;  %v213_v45 = vrot.slane %v205_v39, %v3768_v29  ;;  %v221_v48 = vcombine.high %v3785_v40, %v3695_v25 }
  0x9c   :  { %v3750_v13 = vpop.trf.xlu1  ;;  %v3752_v14 = vpop.trf.xlu0  ;;  %v255_v52 = vcombine.low %v232_v44, %v247_v43  ;;  %v220_v54 = vrot.slane %v206_v46, %v3768_v29  ;;  %v254_v55 = vrot.slane %v240_v47, %v3754_v15  ;;  %v239_v58 = vrot.slane %v225_v51, %v3754_v15 }
  0x9d   :  { %v223_v53 = vcombine.high %v213_v45, %v3695_v25  ;;  %v256_v59 = vcombine.high %v232_v44, %v247_v43  ;;  %v313_v3 = vrot.slane %v3750_v13, %v3754_v15  ;;  %v298_v6 = vrot.slane %v3752_v14, %v3754_v15 }
  0x9e   :  { %v224_v60 = vcombine.high %v220_v54, %v3695_v25  ;;  %v263_v61 = vrot.slane %v255_v52, %v3768_v29  ;;  %v271_v2 = vcombine.low %v239_v58, %v254_v55  ;;  %v272_v9 = vcombine.high %v239_v58, %v254_v55 }
  0x9f   :  { %v270_v1 = vrot.slane %v256_v59, %v3768_v29  ;;  %v306_v10 = vcombine.high %v3750_v13, %v3695_v25  ;;  %v291_v16 = vcombine.high %v3752_v14, %v3695_v25  ;;  %v321_v17 = vcombine.low %v298_v6, %v313_v3 }
  0xa0   :  { %v3756_v18 = vpop.trf.xlu1  ;;  %v3758_v19 = vpop.trf.xlu0  ;;  %v287_v0 = vcombine.high %v263_v61, %v3695_v25  ;;  %v279_v8 = vrot.slane %v271_v2, %v3768_v29  ;;  %v286_v21 = vrot.slane %v272_v9, %v3768_v29  ;;  %v322_v14 = vcombine.high %v298_v6, %v313_v3 }
  0xa1   :  { %v288_v7 = vcombine.high %v270_v1, %v3695_v25  ;;  %v320_v13 = vrot.slane %v306_v10, %v3754_v15  ;;  %v305_v27 = vrot.slane %v291_v16, %v3754_v15  ;;  %v329_v32 = vrot.slane %v321_v17, %v3768_v29 }
  0xa2   :  { %v289_v20 = vcombine.high %v279_v8, %v3695_v25  ;;  %v290_v28 = vcombine.high %v286_v21, %v3695_v25  ;;  %v379_v43 = vrot.slane %v3756_v18, %v3754_v15  ;;  %v364_v46 = vrot.slane %v3758_v19, %v3754_v15 }
  0xa3   :  { %v353_v35 = vcombine.high %v329_v32, %v3695_v25  ;;  %v337_v39 = vcombine.low %v305_v27, %v320_v13  ;;  %v338_v51 = vcombine.high %v305_v27, %v320_v13  ;;  %v372_v52 = vcombine.high %v3756_v18, %v3695_v25 }
  0xa4   :  { %v3762_v23 = vpop.trf.xlu1  ;;  %v3764_v24 = vpop.trf.xlu0  ;;  %v357_v55 = vcombine.high %v3758_v19, %v3695_v25  ;;  %v387_v58 = vcombine.low %v364_v46, %v379_v43  ;;  %v388_v19 = vcombine.high %v364_v46, %v379_v43 }
  0xa5   :  { %v386_v18 = vrot.slane %v372_v52, %v3754_v15  ;;  %v445_v16 = vrot.slane %v3762_v23, %v3754_v15  ;;  %v430_v17 = vrot.slane %v3764_v24, %v3754_v15 }
  0xa6   :  { %v395_v3 = vrot.slane %v387_v58, %v3768_v29  ;;  %v402_v9 = vrot.slane %v388_v19, %v3768_v29 }
  0xa8   :  { %v3770_v30 = vpop.trf.xlu1  ;;  %v3772_v31 = vpop.trf.xlu0  ;;  %v420_v13 = vcombine.high %v402_v9, %v3695_v25 }
  0xab   :  { %2276 = vrot.lane.b32.xlu1 %v204_v34, %s3692_s17 }
  0xac   :  { %v3778_v36 = vpop.trf.xlu1  ;;  %v3780_v37 = vpop.trf.xlu0 }
  0xaf   :  { %2280 = vrot.lane.b32.xlu1 %v222_v38, %s3696_s0  ;;  %v336_v38 = vrot.slane %v322_v14, %v3768_v29 }
  0xb0   :  { %v3787_v41 = vpop.trf.xlu1  ;;  %v3789_v42 = vpop.trf.xlu0 }
  0xb1   :  { %v354_v47 = vcombine.high %v336_v38, %v3695_v25 }
  0xb3   :  { %2284 = vrot.lane.b32.xlu1 %v213_v45, %s3697_s20 }
  0xb4   :  { %v3798_v49 = vpop.trf.xlu1  ;;  %v3800_v50 = vpop.trf.xlu0 }
  0xb6   :  { %2272 = vrot.lane.b32.xlu0 %v221_v48, %s3698_s21  ;;  %v345_v48 = vrot.slane %v337_v39, %v3768_v29 }
  0xb7   :  { %2288 = vrot.lane.b32.xlu1 %v223_v53, %s3699_s22 }
  0xb8   :  { %v3808_v56 = vpop.trf.xlu1  ;;  %v3810_v57 = vpop.trf.xlu0  ;;  %v355_v59 = vcombine.high %v345_v48, %v3695_v25 }
  0xba   :  { %2292 = vrot.lane.b32.xlu0 %v220_v54, %s3700_s23 }
  0xbb   :  { %2296 = vrot.lane.b32.xlu1 %v224_v60, %s3701_s24  ;;  %v352_v60 = vrot.slane %v338_v51, %v3768_v29 }
  0xbc   :  { %v3817_v62 = vpop.trf.xlu1  ;;  %v3819_v63 = vpop.trf.xlu0 }
  0xbd   :  { %v356_v2 = vcombine.high %v352_v60, %v3695_v25 }
  0xbe   :  { %2300 = vrot.lane.b32.xlu0 %v263_v61, %s3702_s25 }
  0xbf   :  { %2304 = vrot.lane.b32.xlu1 %v287_v0, %s3703_s26 }
  0xc0   :  { %v3827_v4 = vpop.trf.xlu1  ;;  %v3829_v5 = vpop.trf.xlu0 }
  0xc2   :  { %2308 = vrot.lane.b32.xlu0 %v270_v1, %s3704_s27  ;;  %v371_v1 = vrot.slane %v357_v55, %v3754_v15 }
  0xc3   :  { %2312 = vrot.lane.b32.xlu1 %v288_v7, %s3705_s28 }
  0xc4   :  { %v3839_v11 = vpop.trf.xlu1  ;;  %v3841_v12 = vpop.trf.xlu0  ;;  %v403_v10 = vcombine.low %v371_v1, %v386_v18  ;;  %v404_v14 = vcombine.high %v371_v1, %v386_v18 }
  0xc6   :  { %2316 = vrot.lane.b32.xlu0 %v279_v8, %s3706_s29  ;;  %v419_v8 = vcombine.high %v395_v3, %v3695_v25  ;;  %v411_v27 = vrot.slane %v403_v10, %v3768_v29  ;;  %v418_v46 = vrot.slane %v404_v14, %v3768_v29 }
  0xc7   :  { %2320 = vrot.lane.b32.xlu1 %v289_v20, %s3707_s30 }
  0xc8   :  { %v3850_v22 = vpop.trf.xlu1  ;;  %v3852_v26 = vpop.trf.xlu0  ;;  %v421_v43 = vcombine.high %v411_v27, %v3695_v25  ;;  %v422_v55 = vcombine.high %v418_v46, %v3695_v25 }
  0xca   :  { %2324 = vrot.lane.b32.xlu0 %v286_v21, %s5333_s2 }
  0xcb   :  { %2328 = vrot.lane.b32.xlu1 %v290_v28, %s5325_s3  ;;  %v438_v28 = vcombine.high %v3762_v23, %v3695_v25 }
  0xcc   :  { %v3859_v33 = vpop.trf.xlu1  ;;  %v3861_v34 = vpop.trf.xlu0 }
  0xcd   :  { %v452_v23 = vrot.slane %v438_v28, %v3754_v15 }
  0xce   :  { %2332 = vrot.lane.b32.xlu0 %v329_v32, %s3710_s4  ;;  %v423_v32 = vcombine.high %v3764_v24, %v3695_v25  ;;  %v454_v24 = vcombine.high %v430_v17, %v445_v16 }
  0xcf   :  { %2336 = vrot.lane.b32.xlu1 %v353_v35, %s3711_s5  ;;  %v453_v35 = vcombine.low %v430_v17, %v445_v16  ;;  %v504_v16 = vcombine.high %v3770_v30, %v3695_v25  ;;  %v489_v17 = vcombine.high %v3772_v31, %v3695_v25 }
  0xd0   :  { %v3869_v44 = vpop.trf.xlu1  ;;  %v3871_v45 = vpop.trf.xlu0 }
  0xd2   :  { %2340 = vrot.lane.b32.xlu0 %v336_v38, %s5322_s6 }
  0xd3   :  { %2344 = vrot.lane.b32.xlu1 %v354_v47, %s3713_s7  ;;  %v437_v47 = vrot.slane %v423_v32, %v3754_v15 }
  0xd4   :  { %v3881_v53 = vpop.trf.xlu1  ;;  %v3883_v54 = vpop.trf.xlu0 }
  0xd5   :  { %v469_v58 = vcombine.low %v437_v47, %v452_v23  ;;  %v470_v19 = vcombine.high %v437_v47, %v452_v23 }
  0xd6   :  { %2348 = vrot.lane.b32.xlu0 %v345_v48, %s3714_s8  ;;  %v3936_v48 = vrot.slane %v453_v35, %v3768_v29  ;;  %v518_v35 = vrot.slane %v504_v16, %v3754_v15 }
  0xd7   :  { %2352 = vrot.lane.b32.xlu1 %v355_v59, %s5318_s9  ;;  %v484_v14 = vrot.slane %v470_v19, %v3768_v29 }
  0xd8   :  { %v3892_v61 = vpop.trf.xlu1  ;;  %v3894_v0 = vpop.trf.xlu0  ;;  %v485_v59 = vcombine.high %v3936_v48, %v3695_v25 }
  0xda   :  { %2356 = vrot.lane.b32.xlu0 %v352_v60, %s3716_s10  ;;  %v468_v60 = vrot.slane %v454_v24, %v3768_v29 }
  0xdb   :  { %2360 = vrot.lane.b32.xlu1 %v356_v2, %s3717_s11  ;;  %v511_v2 = vrot.slane %v3770_v30, %v3754_v15  ;;  %v503_v30 = vrot.slane %v489_v17, %v3754_v15  ;;  %v570_v17 = vcombine.high %v3778_v36, %v3695_v25 }
  0xdc   :  { %v3901_v6 = vpop.trf.xlu1  ;;  %v3903_v7 = vpop.trf.xlu0 }
  0xdd   :  { %v535_v24 = vcombine.low %v503_v30, %v518_v35  ;;  %v536_v19 = vcombine.high %v503_v30, %v518_v35 }
  0xde   :  { %2364 = vrot.lane.b32.xlu0 %v395_v3, %s5301_s12  ;;  %v496_v3 = vrot.slane %v3772_v31, %v3754_v15  ;;  %v488_v31 = vcombine.high %v484_v14, %v3695_v25 }
  0xdf   :  { %2368 = vrot.lane.b32.xlu1 %v419_v8, %s3719_s13  ;;  %v486_v8 = vcombine.high %v468_v60, %v3695_v25  ;;  %v550_v35 = vrot.slane %v536_v19, %v3768_v29 }
  0xe0   :  { %v3913_v20 = vpop.trf.xlu1  ;;  %v3915_v21 = vpop.trf.xlu0 }
  0xe2   :  { %2372 = vrot.lane.b32.xlu0 %v402_v9, %s3720_s14  ;;  %v477_v9 = vrot.slane %v469_v58, %v3768_v29 }
  0xe3   :  { %2376 = vrot.lane.b32.xlu1 %v420_v13, %s3721_s15  ;;  %v519_v13 = vcombine.low %v496_v3, %v511_v2 }
  0xe4   :  { %v3925_v38 = vpop.trf.xlu1  ;;  %v3927_v39 = vpop.trf.xlu0 }
  0xe6   :  { %2380 = vrot.lane.b32.xlu0 %v411_v27, %s5296_s16  ;;  %s5347_s16 = smov 124   ;;  %v487_v27 = vcombine.high %v477_v9, %v3695_v25 }
  0xe7   :  { %2384 = vrot.lane.b32.xlu1 %v421_v43, %s3723_s18  ;;  %v520_v43 = vcombine.high %v496_v3, %v511_v2  ;;  %v562_v2 = vrot.slane %v3780_v37, %v3754_v15 }
  0xe8   :  { %v3938_v51 = vpop.trf.xlu1  ;;  %v3940_v52 = vpop.trf.xlu0 }
  0xe9   :  { %v534_v58 = vrot.slane %v520_v43, %v3768_v29 }
  0xea   :  { %2388 = vrot.lane.b32.xlu0 %v418_v46, %s3724_s19  ;;  %v527_v46 = vrot.slane %v519_v13, %v3768_v29  ;;  %v555_v13 = vcombine.high %v3780_v37, %v3695_v25  ;;  %v554_v37 = vcombine.high %v550_v35, %v3695_v25 }
  0xeb   :  { %2392 = vrot.lane.b32.xlu1 %v422_v55, %s5347_s16  ;;  %v552_v3 = vcombine.high %v534_v58, %v3695_v25 }
  0xec   :  { %v3948_v18 = vpop.trf.xlu1  ;;  %v3951_v1 = vpop.trf.xlu0  ;;  %v551_v55 = vcombine.high %v527_v46, %v3695_v25 }
  0xed   :  { %5353 = vst [vmem:[#allocation8_spill] sm:$0xff] %v3948_v18  ;;  %5354 = vst [vmem:[#allocation9_spill] sm:$0xff] %v3951_v1 }
  0xee   :  { %2396 = vrot.lane.b32.xlu0 %v485_v59, %s3698_s21 }
  0xef   :  { %2400 = vrot.lane.b32.xlu1 %v468_v60, %s3692_s17  ;;  %v577_v60 = vrot.slane %v3778_v36, %v3754_v15  ;;  %v569_v36 = vrot.slane %v555_v13, %v3754_v15 }
  0xf0   :  { %v3960_v10 = vpop.trf.xlu1  ;;  %v3970_v28 = vpop.trf.xlu0 }
  0xf1   :  { %5355 = vst [vmem:[#allocation10_spill] sm:$0xff] %v3960_v10  ;;  %5356 = vst [vmem:[#allocation11_spill] sm:$0xff] %v3970_v28 }
  0xf2   :  { %2404 = vrot.lane.b32.xlu0 %v486_v8, %s3696_s0  ;;  %v543_v8 = vrot.slane %v535_v24, %v3768_v29 }
  0xf3   :  { %2408 = vrot.lane.b32.xlu1 %v477_v9, %s3697_s20 }
  0xf4   :  { %v3972_v32 = vpop.trf.xlu1  ;;  %v3983_v47 = vpop.trf.xlu0 }
  0xf5   :  { %5357 = vst [vmem:[#allocation12_spill] sm:$0xff] %v3972_v32  ;;  %5359 = vst [vmem:[#allocation14_spill] sm:$0xff] %v3983_v47 }
  0xf6   :  { %2412 = vrot.lane.b32.xlu0 %v487_v27, %s3699_s22  ;;  %v585_v27 = vcombine.low %v562_v2, %v577_v60 }
  0xf7   :  { %2416 = vrot.lane.b32.xlu1 %v484_v14, %s3700_s23  ;;  %v553_v14 = vcombine.high %v543_v8, %v3695_v25 }
  0xf8   :  { %v3980_v23 = vpop.trf.xlu1  ;;  %v3998_v9 = vpop.trf.xlu0  ;;  %v593_v24 = vrot.slane %v585_v27, %v3768_v29 }
  0xf9   :  { %5358 = vst [vmem:[#allocation13_spill] sm:$0xff] %v3980_v23  ;;  %5361 = vst [vmem:[#allocation16_spill] sm:$0xff] %v3998_v9 }
  0xfa   :  { %2420 = vrot.lane.b32.xlu0 %v488_v31, %s3701_s24  ;;  %v584_v31 = vrot.slane %v570_v17, %v3754_v15  ;;  %v628_v17 = vrot.slane %v3789_v42, %v3754_v15 }
  0xfb   :  { %2424 = vrot.lane.b32.xlu1 %v527_v46, %s3702_s25  ;;  %v586_v46 = vcombine.high %v562_v2, %v577_v60  ;;  %v643_v2 = vrot.slane %v3787_v41, %v3754_v15 }
  0xfc   :  { %v3988_v59 = vpop.trf.xlu1  ;;  %v4013_v43 = vpop.trf.xlu0  ;;  %v602_v60 = vcombine.high %v569_v36, %v584_v31 }
  0xfd   :  { %5360 = vst [vmem:[#allocation15_spill] sm:$0xff] %v3988_v59  ;;  %5364 = vst [vmem:[#allocation19_spill] sm:$0xff] %v4013_v43 }
  0xfe   :  { %2428 = vrot.lane.b32.xlu0 %v551_v55, %s3703_s26 }
  0xff   :  { %2432 = vrot.lane.b32.xlu1 %v534_v58, %s3704_s27  ;;  %v601_v58 = vcombine.low %v569_v36, %v584_v31  ;;  %v636_v31 = vcombine.high %v3787_v41, %v3695_v25  ;;  %v621_v36 = vcombine.high %v3789_v42, %v3695_v25 }
 0x100   :  { %v4000_v16 = vpop.trf.xlu1  ;;  %v4024_v19 = vpop.trf.xlu0 }
 0x101   :  { %5362 = vst [vmem:[#allocation17_spill] sm:$0xff] %v4000_v16  ;;  %5366 = vst [vmem:[#allocation21_spill] sm:$0xff] %v4024_v19  ;;  %v609_v27 = vrot.slane %v601_v58, %v3768_v29  ;;  %v650_v58 = vrot.slane %v636_v31, %v3754_v15  ;;  %v635_v41 = vrot.slane %v621_v36, %v3754_v15 }
 0x102   :  { %2436 = vrot.lane.b32.xlu0 %v552_v3, %s3705_s28  ;;  %v617_v3 = vcombine.high %v593_v24, %v3695_v25 }
 0x103   :  { %2440 = vrot.lane.b32.xlu1 %v543_v8, %s3706_s29  ;;  %v600_v8 = vrot.slane %v586_v46, %v3768_v29  ;;  %v651_v46 = vcombine.low %v628_v17, %v643_v2 }
 0x104   :  { %v4010_v30 = vpop.trf.xlu1 }
 0x105   :  { %5363 = vst [vmem:[#allocation18_spill] sm:$0xff] %v4010_v30  ;;  %v618_v13 = vcombine.high %v600_v8, %v3695_v25  ;;  %v659_v19 = vrot.slane %v651_v46, %v3768_v29  ;;  %v668_v46 = vcombine.high %v635_v41, %v650_v58 }
 0x106   :  { %2444 = vrot.lane.b32.xlu0 %v553_v14, %s3707_s30 }
 0x107   :  { %2448 = vrot.lane.b32.xlu1 %v550_v35, %s5333_s2  ;;  %v4038_v35 = vpop.trf.xlu0 }
 0x108   :  { %v4022_v55 = vpop.trf.xlu1  ;;  %5368 = vst [vmem:[#allocation23_spill] sm:$0xff] %v4038_v35 }
 0x109   :  { %5365 = vst [vmem:[#allocation20_spill] sm:$0xff] %v4022_v55 }
 0x10a   :  { %2452 = vrot.lane.b32.xlu0 %v554_v37, %s5325_s3  ;;  %v619_v37 = vcombine.high %v609_v27, %v3695_v25 }
 0x10b   :  { %2456 = vrot.lane.b32.xlu1 %v593_v24, %s3710_s4  ;;  %v616_v24 = vrot.slane %v602_v60, %v3768_v29  ;;  %v667_v60 = vcombine.low %v635_v41, %v650_v58  ;;  %v682_v41 = vrot.slane %v668_v46, %v3768_v29 }
 0x10c   :  { %v4036_v14 = vpop.trf.xlu1 }
 0x10d   :  { %5367 = vst [vmem:[#allocation22_spill] sm:$0xff] %v4036_v14  ;;  %v620_v42 = vcombine.high %v616_v24, %v3695_v25 }
 0x10e   :  { %2460 = vrot.lane.b32.xlu0 %v617_v3, %s3711_s5 }
 0x10f   :  { %2464 = vrot.lane.b32.xlu1 %v600_v8, %s5322_s6  ;;  %v652_v8 = vcombine.high %v628_v17, %v643_v2  ;;  %v694_v2 = vrot.slane %v3800_v50, %v3754_v15 }
 0x110   :  { %v4051_v3 = vpop.trf.xlu1 }
 0x111   :  { %5369 = vst [vmem:[#allocation24_spill] sm:$0xff] %v4051_v3  ;;  %v666_v31 = vrot.slane %v652_v8, %v3768_v29  ;;  %v702_v8 = vcombine.high %v3798_v49, %v3695_v25 }
 0x112   :  { %2468 = vrot.lane.b32.xlu0 %v618_v13, %s3713_s7  ;;  %v4054_v13 = vpop.trf.xlu0 }
 0x113   :  { %2472 = vrot.lane.b32.xlu1 %v609_v27, %s3714_s8  ;;  %5370 = vst [vmem:[#allocation25_spill] sm:$0xff] %v4054_v13  ;;  %v683_v27 = vcombine.high %v659_v19, %v3695_v25 }
 0x116   :  { %2476 = vrot.lane.b32.xlu0 %v619_v37, %s5318_s9  ;;  %v709_v37 = vrot.slane %v3798_v49, %v3754_v15  ;;  %v4068_v36 = vpop.trf.xlu0 }
 0x117   :  { %2480 = vrot.lane.b32.xlu1 %v616_v24, %s3716_s10  ;;  %5371 = vst [vmem:[#allocation26_spill] sm:$0xff] %v4068_v36  ;;  %v684_v24 = vcombine.high %v666_v31, %v3695_v25 }
 0x118   :  { %v717_v3 = vcombine.low %v694_v2, %v709_v37 }
 0x11a   :  { %2484 = vrot.lane.b32.xlu0 %v620_v42, %s3717_s11  ;;  %v687_v42 = vcombine.high %v3800_v50, %v3695_v25  ;;  %v4089_v50 = vrot.slane %v717_v3, %v3768_v29 }
 0x11b   :  { %2488 = vrot.lane.b32.xlu1 %v659_v19, %s5301_s12  ;;  %v675_v19 = vrot.slane %v667_v60, %v3768_v29  ;;  %s5372_s12 = smov 112   ;;  %v716_v60 = vrot.slane %v702_v8, %v3754_v15 }
 0x11c   :  { %v701_v49 = vrot.slane %v687_v42, %v3754_v15  ;;  %v749_v8 = vcombine.high %v4089_v50, %v3695_v25  ;;  %v775_v42 = vrot.slane %v3808_v56, %v3754_v15 }
 0x11d   :  { %v4066_v17 = vpop.permute.xlu1 %2276  ;;  %v685_v58 = vcombine.high %v675_v19, %v3695_v25 }
 0x11e   :  { %2492 = vrot.lane.b32.xlu0 %v683_v27, %s3719_s13  ;;  %v4082_v27 = vpop.trf.xlu0  ;;  %v734_v3 = vcombine.high %v701_v49, %v716_v60 }
 0x11f   :  { %2496 = vrot.lane.b32.xlu1 %v666_v31, %s3720_s14  ;;  %5373 = vst [vmem:[#allocation27_spill] sm:$0xff] %v4082_v27  ;;  %v718_v31 = vcombine.high %v694_v2, %v709_v37  ;;  %v733_v27 = vcombine.low %v701_v49, %v716_v60  ;;  %v768_v60 = vcombine.high %v3808_v56, %v3695_v25 }
 0x120   :  { %v748_v13 = vrot.slane %v734_v3, %v3768_v29 }
 0x121   :  { %v4078_v16 = vpop.permute.xlu1 %2280  ;;  %v732_v37 = vrot.slane %v718_v31, %v3768_v29  ;;  %v741_v43 = vrot.slane %v733_v27, %v3768_v29  ;;  %v753_v31 = vcombine.high %v3810_v57, %v3695_v25 }
 0x122   :  { %2500 = vrot.lane.b32.xlu0 %v684_v24, %s3721_s15 }
 0x123   :  { %2504 = vrot.lane.b32.xlu1 %v675_v19, %s5372_s12  ;;  %v686_v19 = vcombine.high %v682_v41, %v3695_v25  ;;  %v750_v14 = vcombine.high %v732_v37, %v3695_v25  ;;  %v751_v59 = vcombine.high %v741_v43, %v3695_v25  ;;  %v767_v56 = vrot.slane %v753_v31, %v3754_v15 }
 0x125   :  { %v4091_v36 = vpop.permute.xlu1 %2284 }
 0x126   :  { %2508 = vrot.lane.b32.xlu0 %v685_v58, %s3723_s18  ;;  %v760_v58 = vrot.slane %v3810_v57, %v3754_v15  ;;  %v752_v57 = vcombine.high %v748_v13, %v3695_v25 }
 0x127   :  { %2512 = vrot.lane.b32.xlu1 %v682_v41, %s3724_s19 }
 0x128   :  { %v4095_v24 = vpop.permute.xlu0 %2272 }
 0x129   :  { %v4098_v46 = vpop.permute.xlu1 %2288 }
 0x12a   :  { %2516 = vrot.lane.b32.xlu0 %v686_v19, %s5347_s16  ;;  %v783_v19 = vcombine.low %v760_v58, %v775_v42 }
 0x12b   :  { %2520 = vrot.lane.b32.xlu1 %v749_v8, %s3698_s21 }
 0x12c   :  { %v4105_v2 = vpop.permute.xlu0 %2292  ;;  %v791_v35 = vrot.slane %v783_v19, %v3768_v29  ;;  %v826_v19 = vrot.slane %v3819_v63, %v3754_v15 }
 0x12d   :  { %v4111_v41 = vpop.permute.xlu1 %2296 }
 0x12e   :  { %2524 = vrot.lane.b32.xlu0 %v732_v37, %s3692_s17  ;;  %v784_v37 = vcombine.high %v760_v58, %v775_v42  ;;  %v841_v42 = vrot.slane %v3817_v62, %v3754_v15 }
 0x12f   :  { %2528 = vrot.lane.b32.xlu1 %v750_v14, %s3696_s0  ;;  %v782_v14 = vrot.slane %v768_v60, %v3754_v15  ;;  %v815_v60 = vcombine.high %v791_v35, %v3695_v25 }
 0x130   :  { %v4119_v49 = vpop.permute.xlu0 %2300  ;;  %v798_v31 = vrot.slane %v784_v37, %v3768_v29 }
 0x131   :  { %v4123_v8 = vpop.permute.xlu1 %2304 }
 0x132   :  { %2532 = vrot.lane.b32.xlu0 %v741_v43, %s3697_s20  ;;  %v816_v30 = vcombine.high %v798_v31, %v3695_v25 }
 0x133   :  { %2536 = vrot.lane.b32.xlu1 %v751_v59, %s3699_s22  ;;  %v799_v59 = vcombine.low %v767_v56, %v782_v14 }
 0x134   :  { %v4130_v27 = vpop.permute.xlu0 %2308 }
 0x135   :  { %v4133_v55 = vpop.permute.xlu1 %2312  ;;  %v807_v9 = vrot.slane %v799_v59, %v3768_v29 }
 0x136   :  { %2540 = vrot.lane.b32.xlu0 %v748_v13, %s3700_s23  ;;  %v800_v13 = vcombine.high %v767_v56, %v782_v14  ;;  %v819_v14 = vcombine.high %v3819_v63, %v3695_v25  ;;  %v849_v56 = vcombine.low %v826_v19, %v841_v42 }
 0x137   :  { %2544 = vrot.lane.b32.xlu1 %v752_v57, %s3701_s24  ;;  %v817_v23 = vcombine.high %v807_v9, %v3695_v25 }
 0x138   :  { %v4139_v43 = vpop.permute.xlu0 %2316  ;;  %v814_v47 = vrot.slane %v800_v13, %v3768_v29  ;;  %v857_v28 = vrot.slane %v849_v56, %v3768_v29  ;;  %v892_v56 = vrot.slane %v3829_v5, %v3754_v15 }
 0x139   :  { %v4141_v3 = vpop.permute.xlu1 %2320 }
 0x13a   :  { %5374 = vst [vmem:[#allocation28_spill] sm:$0xff] %v4141_v3  ;;  %2548 = vrot.lane.b32.xlu0 %v791_v35, %s3702_s25  ;;  %v834_v35 = vcombine.high %v3817_v62, %v3695_v25  ;;  %v833_v62 = vrot.slane %v819_v14, %v3754_v15  ;;  %v818_v63 = vcombine.high %v814_v47, %v3695_v25 }
 0x13b   :  { %2552 = vrot.lane.b32.xlu1 %v815_v60, %s3703_s26 }
 0x13c   :  { %v4149_v58 = vpop.permute.xlu0 %2324 }
 0x13d   :  { %5375 = vst [vmem:[#allocation29_spill] sm:$0xff] %v4149_v58  ;;  %v4153_v57 = vpop.permute.xlu1 %2328 }
 0x13e   :  { %5376 = vst [vmem:[#allocation30_spill] sm:$0xff] %v4153_v57  ;;  %2556 = vrot.lane.b32.xlu0 %v798_v31, %s3704_s27  ;;  %v850_v31 = vcombine.high %v826_v19, %v841_v42 }
 0x13f   :  { %2560 = vrot.lane.b32.xlu1 %v816_v30, %s3705_s28  ;;  %v848_v30 = vrot.slane %v834_v35, %v3754_v15  ;;  %v881_v35 = vcombine.high %v857_v28, %v3695_v25 }
 0x140   :  { %v4161_v37 = vpop.permute.xlu0 %2332  ;;  %v864_v14 = vrot.slane %v850_v31, %v3768_v29 }
 0x141   :  { %5377 = vst [vmem:[#allocation31_spill] sm:$0xff] %v4161_v37  ;;  %v4165_v60 = vpop.permute.xlu1 %2336  ;;  %v866_v42 = vcombine.high %v833_v62, %v848_v30 }
 0x142   :  { %5378 = vst [vmem:[#allocation32_spill] sm:$0xff] %v4165_v60  ;;  %2564 = vrot.lane.b32.xlu0 %v807_v9, %s3706_s29  ;;  %v882_v10 = vcombine.high %v864_v14, %v3695_v25 }
 0x143   :  { %2568 = vrot.lane.b32.xlu1 %v817_v23, %s3707_s30  ;;  %v865_v23 = vcombine.low %v833_v62, %v848_v30  ;;  %v885_v62 = vcombine.high %v3829_v5, %v3695_v25 }
 0x144   :  { %v4172_v59 = vpop.permute.xlu0 %2340 }
 0x145   :  { %5379 = vst [vmem:[#allocation33_spill] sm:$0xff] %v4172_v59  ;;  %v4175_v32 = vpop.permute.xlu1 %2344 }
 0x146   :  { %5380 = vst [vmem:[#allocation34_spill] sm:$0xff] %v4175_v32  ;;  %2572 = vrot.lane.b32.xlu0 %v814_v47, %s5333_s2  ;;  %v907_v47 = vrot.slane %v3827_v4, %v3754_v15 }
 0x147   :  { %2576 = vrot.lane.b32.xlu1 %v818_v63, %s5325_s3 }
 0x148   :  { %v4181_v9 = vpop.permute.xlu0 %2348  ;;  %v915_v31 = vcombine.low %v892_v56, %v907_v47 }
 0x149   :  { %5381 = vst [vmem:[#allocation35_spill] sm:$0xff] %v4181_v9  ;;  %v4183_v13 = vpop.permute.xlu1 %2352 }
 0x14a   :  { %5382 = vst [vmem:[#allocation36_spill] sm:$0xff] %v4183_v13  ;;  %2580 = vrot.lane.b32.xlu0 %v857_v28, %s3710_s4  ;;  %v873_v13 = vrot.slane %v865_v23, %v3768_v29  ;;  %v900_v28 = vcombine.high %v3827_v4, %v3695_v25  ;;  %v899_v4 = vrot.slane %v885_v62, %v3754_v15 }
 0x14b   :  { %2584 = vrot.lane.b32.xlu1 %v881_v35, %s3711_s5 }
 0x14c   :  { %v4189_v19 = vpop.permute.xlu0 %2356 }
 0x14d   :  { %5383 = vst [vmem:[#allocation37_spill] sm:$0xff] %v4189_v19  ;;  %v4195_v63 = vpop.permute.xlu1 %2360  ;;  %v880_v19 = vrot.slane %v866_v42, %v3768_v29 }
 0x14e   :  { %5384 = vst [vmem:[#allocation38_spill] sm:$0xff] %v4195_v63  ;;  %2588 = vrot.lane.b32.xlu0 %v864_v14, %s5322_s6  ;;  %v883_v63 = vcombine.high %v873_v13, %v3695_v25  ;;  %v916_v14 = vcombine.high %v892_v56, %v907_v47  ;;  %v973_v47 = vrot.slane %v3839_v11, %v3754_v15 }
 0x14f   :  { %2592 = vrot.lane.b32.xlu1 %v882_v10, %s3713_s7  ;;  %v914_v10 = vrot.slane %v900_v28, %v3754_v15  ;;  %v884_v5 = vcombine.high %v880_v19, %v3695_v25 }
 0x150   :  { %v4203_v30 = vpop.permute.xlu0 %2364  ;;  %v930_v62 = vrot.slane %v916_v14, %v3768_v29  ;;  %v951_v14 = vcombine.high %v3841_v12, %v3695_v25 }
 0x151   :  { %5385 = vst [vmem:[#allocation39_spill] sm:$0xff] %v4203_v30  ;;  %v4207_v35 = vpop.permute.xlu1 %2368  ;;  %v931_v42 = vcombine.low %v899_v4, %v914_v10 }
 0x152   :  { %5386 = vst [vmem:[#allocation40_spill] sm:$0xff] %v4207_v35  ;;  %2596 = vrot.lane.b32.xlu0 %v873_v13, %s3714_s8  ;;  %v923_v35 = vrot.slane %v915_v31, %v3768_v29  ;;  %v932_v31 = vcombine.high %v899_v4, %v914_v10 }
 0x153   :  { %2600 = vrot.lane.b32.xlu1 %v883_v63, %s5318_s9  ;;  %s5391_s9 = smov 96  }
 0x154   :  { %v4214_v23 = vpop.permute.xlu0 %2372  ;;  %v947_v28 = vcombine.high %v923_v35, %v3695_v25 }
 0x155   :  { %5387 = vst [vmem:[#allocation41_spill] sm:$0xff] %v4214_v23  ;;  %v4217_v30 = vpop.permute.xlu1 %2376 }
 0x156   :  { %5388 = vst [vmem:[#allocation42_spill] sm:$0xff] %v4217_v30  ;;  %2604 = vrot.lane.b32.xlu0 %v880_v19, %s3716_s10  ;;  %v958_v19 = vrot.slane %v3841_v12, %v3754_v15 }
 0x157   :  { %2608 = vrot.lane.b32.xlu1 %v884_v5, %s3717_s11 }
 0x158   :  { %v4223_v13 = vpop.permute.xlu0 %2380 }
 0x159   :  { %5389 = vst [vmem:[#allocation43_spill] sm:$0xff] %v4223_v13  ;;  %v4225_v63 = vpop.permute.xlu1 %2384  ;;  %v939_v13 = vrot.slane %v931_v42, %v3768_v29 }
 0x15a   :  { %5390 = vst [vmem:[#allocation44_spill] sm:$0xff] %v4225_v63  ;;  %2612 = vrot.lane.b32.xlu0 %v923_v35, %s5391_s9  ;;  %v948_v63 = vcombine.high %v930_v62, %v3695_v25  ;;  %v966_v35 = vcombine.high %v3839_v11, %v3695_v25  ;;  %v965_v11 = vrot.slane %v951_v14, %v3754_v15 }
 0x15b   :  { %2616 = vrot.lane.b32.xlu1 %v947_v28, %s3719_s13  ;;  %v981_v28 = vcombine.low %v958_v19, %v973_v47  ;;  %v949_v4 = vcombine.high %v939_v13, %v3695_v25 }
 0x15c   :  { %v4235_v56 = vpop.permute.xlu0 %2388  ;;  %v980_v42 = vrot.slane %v966_v35, %v3754_v15 }
 0x15d   :  { %5392 = vst [vmem:[#allocation45_spill] sm:$0xff] %v4235_v56  ;;  %v4237_v5 = vpop.permute.xlu1 %2392  ;;  %v4258_v12 = vrot.slane %v981_v28, %v3768_v29 }
 0x15e   :  { %5393 = vst [vmem:[#allocation46_spill] sm:$0xff] %v4237_v5  ;;  %2620 = vrot.lane.b32.xlu0 %v930_v62, %s3720_s14  ;;  %v946_v5 = vrot.slane %v932_v31, %v3768_v29  ;;  %v998_v14 = vcombine.high %v965_v11, %v980_v42 }
 0x15f   :  { %2624 = vrot.lane.b32.xlu1 %v948_v63, %s3721_s15  ;;  %v982_v63 = vcombine.high %v958_v19, %v973_v47  ;;  %v1013_v35 = vcombine.high %v4258_v12, %v3695_v25 }
 0x160   :  { %v4247_v30 = vpop.permute.xlu0 %2396  ;;  %v950_v23 = vcombine.high %v946_v5, %v3695_v25  ;;  %v1012_v59 = vrot.slane %v998_v14, %v3768_v29 }
 0x161   :  { %v4249_v10 = vpop.permute.xlu1 %2400  ;;  %v996_v47 = vrot.slane %v982_v63, %v3768_v29 }
 0x162   :  { %2628 = vrot.lane.b32.xlu0 %v939_v13, %s5372_s12  ;;  %v997_v13 = vcombine.low %v965_v11, %v980_v42  ;;  %v1032_v42 = vcombine.high %v3850_v22, %v3695_v25  ;;  %v1017_v11 = vcombine.high %v3852_v26, %v3695_v25 }
 0x163   :  { %2632 = vrot.lane.b32.xlu1 %v949_v4, %s3723_s18  ;;  %v1014_v28 = vcombine.high %v996_v47, %v3695_v25 }
 0x164   :  { %v4260_v62 = vpop.permute.xlu0 %2404  ;;  %v1005_v9 = vrot.slane %v997_v13, %v3768_v29 }
 0x165   :  { %v4262_v56 = vpop.permute.xlu1 %2408 }
 0x166   :  { %2636 = vrot.lane.b32.xlu0 %v946_v5, %s3724_s19  ;;  %v1039_v5 = vrot.slane %v3850_v22, %v3754_v15  ;;  %v1031_v22 = vrot.slane %v1017_v11, %v3754_v15 }
 0x167   :  { %2640 = vrot.lane.b32.xlu1 %v950_v23, %s5347_s16  ;;  %v1024_v23 = vrot.slane %v3852_v26, %v3754_v15  ;;  %v1016_v26 = vcombine.high %v1012_v59, %v3695_v25 }
 0x168   :  { %v4267_v31 = vpop.permute.xlu0 %2412 }
 0x169   :  { %v4272_v19 = vpop.permute.xlu1 %2416  ;;  %v1048_v60 = vcombine.high %v1024_v23, %v1039_v5 }
 0x16a   :  { %2644 = vrot.lane.b32.xlu0 %v1013_v35, %s3698_s21  ;;  %v1047_v35 = vcombine.low %v1024_v23, %v1039_v5 }
 0x16b   :  { %2648 = vrot.lane.b32.xlu1 %v996_v47, %s3692_s17  ;;  %v1015_v47 = vcombine.high %v1005_v9, %v3695_v25  ;;  %v1062_v11 = vrot.slane %v1048_v60, %v3768_v29 }
 0x16c   :  { %v4281_v4 = vpop.permute.xlu0 %2420  ;;  %v1055_v57 = vrot.slane %v1047_v35, %v3768_v29  ;;  %v1090_v35 = vrot.slane %v3861_v34, %v3754_v15 }
 0x16d   :  { %v4284_v63 = vpop.permute.xlu1 %2424  ;;  %v1080_v1 = vcombine.high %v1062_v11, %v3695_v25 }
 0x16e   :  { %2652 = vrot.lane.b32.xlu0 %v1014_v28, %s3696_s0  ;;  %v1046_v28 = vrot.slane %v1032_v42, %v3754_v15  ;;  %v1079_v42 = vcombine.high %v1055_v57, %v3695_v25 }
 0x16f   :  { %2656 = vrot.lane.b32.xlu1 %v1005_v9, %s3697_s20 }
 0x170   :  { %v4292_v32 = vpop.permute.xlu0 %2428  ;;  %v1063_v14 = vcombine.low %v1031_v22, %v1046_v28  ;;  %v1064_v23 = vcombine.high %v1031_v22, %v1046_v28  ;;  %v1083_v28 = vcombine.high %v3861_v34, %v3695_v25 }
 0x171   :  { %v4296_v13 = vpop.permute.xlu1 %2432 }
 0x172   :  { %2660 = vrot.lane.b32.xlu0 %v1015_v47, %s3699_s22 }
 0x173   :  { %2664 = vrot.lane.b32.xlu1 %v1012_v59, %s3700_s23  ;;  %v1105_v59 = vrot.slane %v3859_v33, %v3754_v15 }
 0x174   :  { %v4302_v37 = vpop.permute.xlu0 %2436 }
 0x175   :  { %v4306_v9 = vpop.permute.xlu1 %2440  ;;  %v1113_v22 = vcombine.low %v1090_v35, %v1105_v59 }
 0x176   :  { %2668 = vrot.lane.b32.xlu0 %v1016_v26, %s3701_s24 }
 0x177   :  { %2672 = vrot.lane.b32.xlu1 %v1055_v57, %s3702_s25  ;;  %v1071_v57 = vrot.slane %v1063_v14, %v3768_v29 }
 0x178   :  { %v4310_v47 = vpop.permute.xlu0 %2444 }
 0x179   :  { %5394 = vst [vmem:[#allocation47_spill] sm:$0xff] %v4310_v47  ;;  %v4314_v5 = vpop.permute.xlu1 %2448 }
 0x17a   :  { %5395 = vst [vmem:[#allocation48_spill] sm:$0xff] %v4314_v5  ;;  %2676 = vrot.lane.b32.xlu0 %v1079_v42, %s3703_s26  ;;  %v1098_v42 = vcombine.high %v3859_v33, %v3695_v25  ;;  %v1097_v33 = vrot.slane %v1083_v28, %v3754_v15 }
 0x17b   :  { %2680 = vrot.lane.b32.xlu1 %v1062_v11, %s3704_s27  ;;  %v1078_v11 = vrot.slane %v1064_v23, %v3768_v29 }
 0x17c   :  { %v4322_v26 = vpop.permute.xlu0 %2452 }
 0x17d   :  { %5396 = vst [vmem:[#allocation49_spill] sm:$0xff] %v4322_v26  ;;  %v4326_v60 = vpop.permute.xlu1 %2456  ;;  %v1081_v26 = vcombine.high %v1071_v57, %v3695_v25  ;;  %v1082_v34 = vcombine.high %v1078_v11, %v3695_v25 }
 0x17e   :  { %5397 = vst [vmem:[#allocation50_spill] sm:$0xff] %v4326_v60  ;;  %2684 = vrot.lane.b32.xlu0 %v1080_v1, %s3705_s28  ;;  %v1112_v1 = vrot.slane %v1098_v42, %v3754_v15  ;;  %v1114_v60 = vcombine.high %v1090_v35, %v1105_v59 }
 0x17f   :  { %2688 = vrot.lane.b32.xlu1 %v1071_v57, %s3706_s29 }
 0x180   :  { %v4334_v18 = vpop.permute.xlu0 %2460  ;;  %v1129_v23 = vcombine.low %v1097_v33, %v1112_v1  ;;  %v1128_v28 = vrot.slane %v1114_v60, %v3768_v29  ;;  %v1130_v35 = vcombine.high %v1097_v33, %v1112_v1  ;;  %v1164_v1 = vcombine.high %v3869_v44, %v3695_v25 }
 0x181   :  { %5398 = vst [vmem:[#allocation51_spill] sm:$0xff] %v4334_v18  ;;  %v4338_v14 = vpop.permute.xlu1 %2464  ;;  %v1121_v18 = vrot.slane %v1113_v22, %v3768_v29  ;;  %v1171_v22 = vrot.slane %v3869_v44, %v3754_v15  ;;  %v1149_v33 = vcombine.high %v3871_v45, %v3695_v25 }
 0x182   :  { %5399 = vst [vmem:[#allocation52_spill] sm:$0xff] %v4338_v14  ;;  %2692 = vrot.lane.b32.xlu0 %v1081_v26, %s3707_s30 }
 0x183   :  { %2696 = vrot.lane.b32.xlu1 %v1078_v11, %s5333_s2  ;;  %v1145_v42 = vcombine.high %v1121_v18, %v3695_v25  ;;  %v1156_v11 = vrot.slane %v3871_v45, %v3754_v15  ;;  %v1163_v44 = vrot.slane %v1149_v33, %v3754_v15 }
 0x184   :  { %v4344_v5 = vpop.permute.xlu0 %2468 }
 0x185   :  { %5400 = vst [vmem:[#allocation53_spill] sm:$0xff] %v4344_v5  ;;  %v4348_v57 = vpop.permute.xlu1 %2472 }
 0x186   :  { %5401 = vst [vmem:[#allocation54_spill] sm:$0xff] %v4348_v57  ;;  %2700 = vrot.lane.b32.xlu0 %v1082_v34, %s5325_s3 }
 0x187   :  { %2704 = vrot.lane.b32.xlu1 %v1121_v18, %s3710_s4  ;;  %v1137_v18 = vrot.slane %v1129_v23, %v3768_v29 }
 0x188   :  { %v4352_v26 = vpop.permute.xlu0 %2476 }
 0x189   :  { %5402 = vst [vmem:[#allocation55_spill] sm:$0xff] %v4352_v26  ;;  %v4356_v59 = vpop.permute.xlu1 %2480  ;;  %v1146_v26 = vcombine.high %v1128_v28, %v3695_v25 }
 0x18a   :  { %5403 = vst [vmem:[#allocation56_spill] sm:$0xff] %v4356_v59  ;;  %2708 = vrot.lane.b32.xlu0 %v1145_v42, %s3711_s5  ;;  %v1179_v42 = vcombine.low %v1156_v11, %v1171_v22 }
 0x18b   :  { %2712 = vrot.lane.b32.xlu1 %v1128_v28, %s5322_s6  ;;  %v1144_v28 = vrot.slane %v1130_v35, %v3768_v29  ;;  %s5408_s6 = smov 84  }
 0x18c   :  { %v4364_v34 = vpop.permute.xlu0 %2484 }
 0x18d   :  { %5404 = vst [vmem:[#allocation57_spill] sm:$0xff] %v4364_v34  ;;  %v4368_v60 = vpop.permute.xlu1 %2488  ;;  %v1147_v34 = vcombine.high %v1137_v18, %v3695_v25  ;;  %v1148_v45 = vcombine.high %v1144_v28, %v3695_v25 }
 0x18e   :  { %5405 = vst [vmem:[#allocation58_spill] sm:$0xff] %v4368_v60  ;;  %2716 = vrot.lane.b32.xlu0 %v1146_v26, %s3713_s7  ;;  %v1178_v26 = vrot.slane %v1164_v1, %v3754_v15  ;;  %v1180_v60 = vcombine.high %v1156_v11, %v1171_v22  ;;  %v1237_v22 = vrot.slane %v3881_v53, %v3754_v15 }
 0x18f   :  { %2720 = vrot.lane.b32.xlu1 %v1137_v18, %s3714_s8  ;;  %v1222_v11 = vrot.slane %v3883_v54, %v3754_v15 }
 0x190   :  { %v4376_v59 = vpop.permute.xlu0 %2492  ;;  %v1195_v35 = vcombine.low %v1163_v44, %v1178_v26  ;;  %v1194_v33 = vrot.slane %v1180_v60, %v3768_v29  ;;  %v1230_v60 = vcombine.high %v3881_v53, %v3695_v25 }
 0x191   :  { %5406 = vst [vmem:[#allocation59_spill] sm:$0xff] %v4376_v59  ;;  %v4380_v23 = vpop.permute.xlu1 %2496  ;;  %v1187_v59 = vrot.slane %v1179_v42, %v3768_v29 }
 0x192   :  { %5407 = vst [vmem:[#allocation60_spill] sm:$0xff] %v4380_v23  ;;  %2724 = vrot.lane.b32.xlu0 %v1147_v34, %s5408_s6 }
 0x193   :  { %2728 = vrot.lane.b32.xlu1 %v1144_v28, %s3716_s10  ;;  %v1211_v1 = vcombine.high %v1187_v59, %v3695_v25  ;;  %v1196_v28 = vcombine.high %v1163_v44, %v1178_v26 }
 0x194   :  { %v4386_v57 = vpop.permute.xlu0 %2500 }
 0x195   :  { %5409 = vst [vmem:[#allocation61_spill] sm:$0xff] %v4386_v57  ;;  %v4390_v18 = vpop.permute.xlu1 %2504  ;;  %v1245_v57 = vcombine.low %v1222_v11, %v1237_v22 }
 0x196   :  { %5410 = vst [vmem:[#allocation62_spill] sm:$0xff] %v4390_v18  ;;  %2732 = vrot.lane.b32.xlu0 %v1148_v45, %s3717_s11  ;;  %v1215_v18 = vcombine.high %v3883_v54, %v3695_v25 }
 0x197   :  { %2736 = vrot.lane.b32.xlu1 %v1187_v59, %s5391_s9  ;;  %v1203_v59 = vrot.slane %v1195_v35, %v3768_v29  ;;  %v1244_v35 = vrot.slane %v1230_v60, %v3754_v15  ;;  %v4425_v54 = vrot.slane %v1245_v57, %v3768_v29  ;;  %v1303_v60 = vrot.slane %v3892_v61, %v3754_v15 }
 0x198   :  { %v4394_v34 = vpop.permute.xlu0 %2508  ;;  %v1229_v53 = vrot.slane %v1215_v18, %v3754_v15 }
 0x199   :  { %5411 = vst [vmem:[#allocation63_spill] sm:$0xff] %v4394_v34  ;;  %v4402_v42 = vpop.permute.xlu1 %2512  ;;  %v1212_v34 = vcombine.high %v1194_v33, %v3695_v25  ;;  %v1213_v44 = vcombine.high %v1203_v59, %v3695_v25  ;;  %5414 = vst [vmem:[#allocation66_spill] sm:$0xff] %v4425_v54  ;;  %v1277_v18 = vcombine.high %v4425_v54, %v3695_v25 }
 0x19a   :  { %5412 = vst [vmem:[#allocation64_spill] sm:$0xff] %v4402_v42  ;;  %2740 = vrot.lane.b32.xlu0 %v1211_v1, %s3719_s13  ;;  %v1210_v1 = vrot.slane %v1196_v28, %v3768_v29  ;;  %v1261_v42 = vcombine.low %v1229_v53, %v1244_v35  ;;  %v1262_v57 = vcombine.high %v1229_v53, %v1244_v35 }
 0x19b   :  { %2744 = vrot.lane.b32.xlu1 %v1194_v33, %s3720_s14  ;;  %v1246_v33 = vcombine.high %v1222_v11, %v1237_v22  ;;  %v1296_v35 = vcombine.high %v3892_v61, %v3695_v25 }
 0x19c   :  { %v4406_v45 = vpop.permute.xlu0 %2516  ;;  %v1269_v54 = vrot.slane %v1261_v42, %v3768_v29  ;;  %v1276_v58 = vrot.slane %v1262_v57, %v3768_v29 }
 0x19d   :  { %5413 = vst [vmem:[#allocation65_spill] sm:$0xff] %v4406_v45  ;;  %v4414_v23 = vpop.permute.xlu1 %2520  ;;  %v1260_v22 = vrot.slane %v1246_v33, %v3768_v29  ;;  %v1281_v33 = vcombine.high %v3894_v0, %v3695_v25 }
 0x19e   :  { %2748 = vrot.lane.b32.xlu0 %v1212_v34, %s3721_s15  ;;  %v1279_v14 = vcombine.high %v1269_v54, %v3695_v25 }
 0x19f   :  { %2752 = vrot.lane.b32.xlu1 %v1203_v59, %s5372_s12  ;;  %v1214_v59 = vcombine.high %v1210_v1, %v3695_v25  ;;  %v1278_v5 = vcombine.high %v1260_v22, %v3695_v25  ;;  %v1295_v61 = vrot.slane %v1281_v33, %v3754_v15 }
 0x1a0   :  { %v4418_v26 = vpop.permute.xlu0 %2524 }
 0x1a1   :  { %v4427_v45 = vpop.permute.xlu1 %2528 }
 0x1a2   :  { %2756 = vrot.lane.b32.xlu0 %v1213_v44, %s3723_s18  ;;  %v1288_v44 = vrot.slane %v3894_v0, %v3754_v15  ;;  %v1280_v0 = vcombine.high %v1276_v58, %v3695_v25 }
 0x1a3   :  { %2760 = vrot.lane.b32.xlu1 %v1210_v1, %s3724_s19 }
 0x1a4   :  { %v4431_v34 = vpop.permute.xlu0 %2532 }
 0x1a5   :  { %v4434_v28 = vpop.permute.xlu1 %2536 }
 0x1a6   :  { %2764 = vrot.lane.b32.xlu0 %v1214_v59, %s5347_s16  ;;  %v1311_v59 = vcombine.low %v1288_v44, %v1303_v60 }
 0x1a7   :  { %2768 = vrot.lane.b32.xlu1 %v1277_v18, %s3698_s21 }
 0x1a8   :  { %v4441_v11 = vpop.permute.xlu0 %2540  ;;  %v1319_v47 = vrot.slane %v1311_v59, %v3768_v29  ;;  %v1354_v59 = vrot.slane %v3903_v7, %v3754_v15 }
 0x1a9   :  { %v4447_v1 = vpop.permute.xlu1 %2544 }
 0x1aa   :  { %2772 = vrot.lane.b32.xlu0 %v1260_v22, %s3692_s17  ;;  %v1312_v22 = vcombine.high %v1288_v44, %v1303_v60  ;;  %v1369_v60 = vrot.slane %v3901_v6, %v3754_v15 }
 0x1ab   :  { %2776 = vrot.lane.b32.xlu1 %v1278_v5, %s3696_s0  ;;  %v1310_v5 = vrot.slane %v1296_v35, %v3754_v15  ;;  %v1343_v35 = vcombine.high %v1319_v47, %v3695_v25 }
 0x1ac   :  { %v4455_v53 = vpop.permute.xlu0 %2548  ;;  %v1326_v33 = vrot.slane %v1312_v22, %v3768_v29 }
 0x1ad   :  { %v4459_v18 = vpop.permute.xlu1 %2552 }
 0x1ae   :  { %2780 = vrot.lane.b32.xlu0 %v1269_v54, %s3697_s20 }
 0x1af   :  { %2784 = vrot.lane.b32.xlu1 %v1279_v14, %s3699_s22  ;;  %v1327_v14 = vcombine.low %v1295_v61, %v1310_v5 }
 0x1b0   :  { %v4466_v42 = vpop.permute.xlu0 %2556 }
 0x1b1   :  { %v4469_v3 = vpop.permute.xlu1 %2560 }
 0x1b2   :  { %2788 = vrot.lane.b32.xlu0 %v1276_v58, %s3700_s23  ;;  %v1328_v58 = vcombine.high %v1295_v61, %v1310_v5  ;;  %v1347_v5 = vcombine.high %v3903_v7, %v3695_v25  ;;  %v1377_v61 = vcombine.low %v1354_v59, %v1369_v60 }
 0x1b3   :  { %2792 = vrot.lane.b32.xlu1 %v1280_v0, %s3701_s24 }
 0x1b4   :  { %v4475_v54 = vpop.permute.xlu0 %2564 }
 0x1b5   :  { %5415 = vst [vmem:[#allocation67_spill] sm:$0xff] %v4475_v54  ;;  %v4477_v57 = vpop.permute.xlu1 %2568  ;;  %v1335_v54 = vrot.slane %v1327_v14, %v3768_v29 }
 0x1b6   :  { %5416 = vst [vmem:[#allocation68_spill] sm:$0xff] %v4477_v57  ;;  %2796 = vrot.lane.b32.xlu0 %v1319_v47, %s3702_s25  ;;  %v1344_v57 = vcombine.high %v1326_v33, %v3695_v25  ;;  %v1362_v47 = vcombine.high %v3901_v6, %v3695_v25  ;;  %v1361_v6 = vrot.slane %v1347_v5, %v3754_v15 }
 0x1b7   :  { %2800 = vrot.lane.b32.xlu1 %v1343_v35, %s3703_s26 }
 0x1b8   :  { %v4485_v44 = vpop.permute.xlu0 %2572  ;;  %v1376_v14 = vrot.slane %v1362_v47, %v3754_v15 }
 0x1b9   :  { %5417 = vst [vmem:[#allocation69_spill] sm:$0xff] %v4485_v44  ;;  %v4489_v0 = vpop.permute.xlu1 %2576  ;;  %v1342_v44 = vrot.slane %v1328_v58, %v3768_v29 }
 0x1ba   :  { %5418 = vst [vmem:[#allocation70_spill] sm:$0xff] %v4489_v0  ;;  %2804 = vrot.lane.b32.xlu0 %v1326_v33, %s3704_s27  ;;  %v1345_v0 = vcombine.high %v1335_v54, %v3695_v25  ;;  %v1378_v33 = vcombine.high %v1354_v59, %v1369_v60  ;;  %v1393_v58 = vcombine.low %v1361_v6, %v1376_v14 }
 0x1bb   :  { %2808 = vrot.lane.b32.xlu1 %v1344_v57, %s3705_s28  ;;  %v1346_v7 = vcombine.high %v1342_v44, %v3695_v25  ;;  %v1394_v60 = vcombine.high %v1361_v6, %v1376_v14  ;;  %v1413_v6 = vcombine.high %v3915_v21, %v3695_v25 }
 0x1bc   :  { %v4497_v22 = vpop.permute.xlu0 %2580  ;;  %v1392_v5 = vrot.slane %v1378_v33, %v3768_v29 }
 0x1bd   :  { %5419 = vst [vmem:[#allocation71_spill] sm:$0xff] %v4497_v22  ;;  %v4501_v35 = vpop.permute.xlu1 %2584 }
 0x1be   :  { %5420 = vst [vmem:[#allocation72_spill] sm:$0xff] %v4501_v35  ;;  %2812 = vrot.lane.b32.xlu0 %v1335_v54, %s3706_s29  ;;  %v1385_v35 = vrot.slane %v1377_v61, %v3768_v29  ;;  %v1420_v61 = vrot.slane %v3915_v21, %v3754_v15 }
 0x1bf   :  { %2816 = vrot.lane.b32.xlu1 %v1345_v0, %s3707_s30 }
 0x1c0   :  { %v4508_v57 = vpop.permute.xlu0 %2588  ;;  %v1409_v47 = vcombine.high %v1385_v35, %v3695_v25 }
 0x1c1   :  { %v4511_v22 = vpop.permute.xlu1 %2592 }
 0x1c2   :  { %2820 = vrot.lane.b32.xlu0 %v1342_v44, %s5333_s2  ;;  %v1435_v44 = vrot.slane %v3913_v20, %v3754_v15 }
 0x1c3   :  { %2824 = vrot.lane.b32.xlu1 %v1346_v7, %s5325_s3  ;;  %s5425_s3 = smov 72  }
 0x1c4   :  { %v4517_v54 = vpop.permute.xlu0 %2596  ;;  %v1443_v33 = vcombine.low %v1420_v61, %v1435_v44 }
 0x1c5   :  { %5421 = vst [vmem:[#allocation73_spill] sm:$0xff] %v4517_v54  ;;  %v4519_v0 = vpop.permute.xlu1 %2600  ;;  %v1401_v54 = vrot.slane %v1393_v58, %v3768_v29 }
 0x1c6   :  { %5422 = vst [vmem:[#allocation74_spill] sm:$0xff] %v4519_v0  ;;  %2828 = vrot.lane.b32.xlu0 %v1385_v35, %s3710_s4  ;;  %v1410_v0 = vcombine.high %v1392_v5, %v3695_v25  ;;  %v1428_v35 = vcombine.high %v3913_v20, %v3695_v25 }
 0x1c7   :  { %2832 = vrot.lane.b32.xlu1 %v1409_v47, %s3711_s5 }
 0x1c8   :  { %v4525_v59 = vpop.permute.xlu0 %2604  ;;  %v1442_v58 = vrot.slane %v1428_v35, %v3754_v15 }
 0x1c9   :  { %5423 = vst [vmem:[#allocation75_spill] sm:$0xff] %v4525_v59  ;;  %v4531_v7 = vpop.permute.xlu1 %2608  ;;  %v1408_v59 = vrot.slane %v1394_v60, %v3768_v29 }
 0x1ca   :  { %5424 = vst [vmem:[#allocation76_spill] sm:$0xff] %v4531_v7  ;;  %2836 = vrot.lane.b32.xlu0 %v1392_v5, %s5425_s3  ;;  %v1411_v7 = vcombine.high %v1401_v54, %v3695_v25  ;;  %v1444_v5 = vcombine.high %v1420_v61, %v1435_v44 }
 0x1cb   :  { %2840 = vrot.lane.b32.xlu1 %v1410_v0, %s3713_s7  ;;  %v1427_v0 = vrot.slane %v1413_v6, %v3754_v15 }
 0x1cc   :  { %v4539_v14 = vpop.permute.xlu0 %2612  ;;  %v1458_v61 = vrot.slane %v1444_v5, %v3768_v29  ;;  %v1494_v5 = vcombine.high %v3925_v38, %v3695_v25 }
 0x1cd   :  { %5426 = vst [vmem:[#allocation77_spill] sm:$0xff] %v4539_v14  ;;  %v4543_v47 = vpop.permute.xlu1 %2616  ;;  %v1451_v14 = vrot.slane %v1443_v33, %v3768_v29 }
 0x1ce   :  { %5427 = vst [vmem:[#allocation78_spill] sm:$0xff] %v4543_v47  ;;  %2844 = vrot.lane.b32.xlu0 %v1401_v54, %s3714_s8  ;;  %v1412_v47 = vcombine.high %v1408_v59, %v3695_v25  ;;  %v3264_v54 = vsel %vm3263_vm0, %v3785_v40, %v4095_v24  ;;  %v1460_v40 = vcombine.high %v1427_v0, %v1442_v58 }
 0x1cf   :  { %2848 = vrot.lane.b32.xlu1 %v1411_v7, %s5408_s6  ;;  %v1459_v7 = vcombine.low %v1427_v0, %v1442_v58  ;;  %v1475_v44 = vcombine.high %v1451_v14, %v3695_v25  ;;  %v3266_v6 = vsel %vm3265_vm1, %v3264_v54, %v4066_v17  ;;  %v1501_v24 = vrot.slane %v3925_v38, %v3754_v15 }
 0x1d0   :  { %v4550_v20 = vpop.permute.xlu0 %2620  ;;  %v3325_v17 = vsel %vm3263_vm0, %v3936_v48, %v4247_v30  ;;  %v1476_v58 = vcombine.high %v1458_v61, %v3695_v25  ;;  %v1479_v54 = vcombine.high %v3927_v39, %v3695_v25  ;;  %v3356_v38 = vsel %vm3263_vm0, %v4089_v50, %v4414_v23 }
 0x1d1   :  { %v4553_v21 = vpop.permute.xlu1 %2624  ;;  %v1467_v0 = vrot.slane %v1459_v7, %v3768_v29  ;;  %v3326_v30 = vsel %vm3265_vm1, %v3325_v17, %v4249_v10  ;;  %v1474_v7 = vrot.slane %v1460_v40, %v3768_v29  ;;  %v1508_v10 = vrot.slane %v1494_v5, %v3754_v15 }
 0x1d2   :  { %2852 = vrot.lane.b32.xlu0 %v1408_v59, %s3716_s10  ;;  %v1486_v59 = vrot.slane %v3927_v39, %v3754_v15  ;;  %v1493_v40 = vrot.slane %v1479_v54, %v3754_v15 }
 0x1d3   :  { %2856 = vrot.lane.b32.xlu1 %v1412_v47, %s3717_s11  ;;  %v3268_v47 = vsel %vm3267_vm2, %v3266_v6, %v4078_v16 }
 0x1d4   :  { %v4562_v60 = vpop.permute.xlu0 %2628  ;;  %v1509_v16 = vcombine.low %v1486_v59, %v1501_v24  ;;  %v3270_v48 = vsel %vm3269_vm3, %v3268_v47, %v4091_v36  ;;  %v3357_v36 = vsel %vm3265_vm1, %v3356_v38, %v4418_v26  ;;  %v1510_v50 = vcombine.high %v1486_v59, %v1501_v24 }
 0x1d5   :  { %v4564_v35 = vpop.permute.xlu1 %2632  ;;  %v1478_v24 = vcombine.high %v1474_v7, %v3695_v25  ;;  %v1525_v54 = vcombine.low %v1493_v40, %v1508_v10  ;;  %v1526_v38 = vcombine.high %v1493_v40, %v1508_v10 }
 0x1d6   :  { %2860 = vrot.lane.b32.xlu0 %v1451_v14, %s5391_s9 }
 0x1d7   :  { %2864 = vrot.lane.b32.xlu1 %v1475_v44, %s3719_s13 }
 0x1d8   :  { %v4576_v33 = vpop.permute.xlu0 %2636 }
 0x1d9   :  { %v4583_v14 = vpop.permute.xlu1 %2640 }
 0x1da   :  { %2868 = vrot.lane.b32.xlu0 %v1458_v61, %s3720_s14  ;;  %v3327_v61 = vsel %vm3267_vm2, %v3326_v30, %v4260_v62  ;;  %v3272_v62 = vsel %vm3271_vm4, %v3270_v48, %v4098_v46 }
 0x1db   :  { %2872 = vrot.lane.b32.xlu1 %v1476_v58, %s3721_s15  ;;  %v1477_v58 = vcombine.high %v1467_v0, %v3695_v25  ;;  %v3328_v23 = vsel %vm3269_vm3, %v3327_v61, %v4262_v56  ;;  %v3274_v59 = vsel %vm3273_vm5, %v3272_v62, %v4105_v2  ;;  %v1524_v2 = vrot.slane %v1510_v50, %v3768_v29 }
 0x1dc   :  { %v2645_v44 = vpop.permute.xlu0 %2644  ;;  %v3329_v17 = vsel %vm3271_vm4, %v3328_v23, %v4267_v31  ;;  %v1545_v23 = vcombine.high %v3940_v52, %v3695_v25 }
 0x1dd   :  { %v3387_v39 = vsel %vm3263_vm0, %v4258_v12, %v2645_v44  ;;  %v2649_v6 = vpop.permute.xlu1 %2648  ;;  %v4615_v12 = vrot.slane %v1509_v16, %v3768_v29  ;;  %v3330_v31 = vsel %vm3273_vm5, %v3329_v17, %v4272_v19 }
 0x1de   :  { %2876 = vrot.lane.b32.xlu0 %v1467_v0, %s5372_s12  ;;  %v3388_v26 = vsel %vm3265_vm1, %v3387_v39, %v2649_v6  ;;  %v3358_v0 = vsel %vm3267_vm2, %v3357_v36, %v4427_v45  ;;  %v3331_v30 = vsel %vm5349_vm6, %v3330_v31, %v4281_v4  ;;  %v1567_v39 = vrot.slane %v3938_v51, %v3754_v15 }
 0x1df   :  { %2880 = vrot.lane.b32.xlu1 %v1477_v58, %s3723_s18  ;;  %v3359_v56 = vsel %vm3269_vm3, %v3358_v0, %v4431_v34  ;;  %v1541_v48 = vcombine.high %v4615_v12, %v3695_v25  ;;  %v3276_v34 = vsel %vm5349_vm6, %v3274_v59, %v4111_v41  ;;  %v1552_v41 = vrot.slane %v3940_v52, %v3754_v15 }
 0x1e0   :  { %v2653_v47 = vpop.permute.xlu0 %2652  ;;  %v3360_v44 = vsel %vm3271_vm4, %v3359_v56, %v4434_v28  ;;  %v1533_v4 = vrot.slane %v1525_v54, %v3768_v29  ;;  %v3278_v28 = vsel %vm5344_vm7, %v3276_v34, %v4119_v49  ;;  %v3332_v6 = vsel %vm5344_vm7, %v3331_v30, %v4284_v63  ;;  %v5429_v30 = vld [vmem:[#allocation67_spill] sm:$0xff] }
 0x1e1   :  { %v3389_v46 = vsel %vm3267_vm2, %v3388_v26, %v2653_v47  ;;  %v2657_v5 = vpop.permute.xlu1 %2656  ;;  %v3361_v61 = vsel %vm3273_vm5, %v3360_v44, %v4441_v11  ;;  %v1542_v58 = vcombine.high %v1524_v2, %v3695_v25  ;;  %v3333_v10 = vsel %vm5346_vm8, %v3332_v6, %v4292_v32  ;;  %v5430_v44 = vld [vmem:[#allocation28_spill] sm:$0xff]  ;;  %v5433_v6 = vld [vmem:[#allocation49_spill] sm:$0xff] }
 0x1e2   :  { %2884 = vrot.lane.b32.xlu0 %v1474_v7, %s3724_s19  ;;  %v3390_v45 = vsel %vm3269_vm3, %v3389_v46, %v2657_v5  ;;  %v3362_v40 = vsel %vm5349_vm6, %v3361_v61, %v4447_v1  ;;  %v1560_v49 = vcombine.high %v3938_v51, %v3695_v25  ;;  %v1575_v26 = vcombine.low %v1552_v41, %v1567_v39  ;;  %v5431_v61 = vld [vmem:[#allocation29_spill] sm:$0xff] }
 0x1e3   :  { %2888 = vrot.lane.b32.xlu1 %v1478_v24, %s5347_s16  ;;  %v3363_v63 = vsel %vm5344_vm7, %v3362_v40, %v4455_v53  ;;  %v3280_v32 = vsel %vm5346_vm8, %v3278_v28, %v4123_v8  ;;  %v1540_v1 = vrot.slane %v1526_v38, %v3768_v29  ;;  %v3334_v47 = vsel %vm5345_vm9, %v3333_v10, %v4296_v13  ;;  %v5432_v38 = vld [vmem:[#allocation48_spill] sm:$0xff] }
 0x1e4   :  { %v2661_v16 = vpop.permute.xlu0 %2660  ;;  %v3282_v51 = vsel %vm5345_vm9, %v3280_v32, %v4130_v27  ;;  %v1543_v0 = vcombine.high %v1533_v4, %v3695_v25  ;;  %v3335_v52 = vsel %vm5327_vm10, %v3334_v47, %v4302_v37  ;;  %v3364_v8 = vsel %vm5346_vm8, %v3363_v63, %v4459_v18 }
 0x1e5   :  { %v3391_v7 = vsel %vm3271_vm4, %v3390_v45, %v2661_v16  ;;  %v2665_v19 = vpop.permute.xlu1 %2664  ;;  %v4688_v27 = vrot.slane %v1560_v49, %v3754_v15  ;;  %v3365_v13 = vsel %vm5345_vm9, %v3364_v8, %v4466_v42  ;;  %v1559_v24 = vrot.slane %v1545_v23, %v3754_v15  ;;  %v5428_v16 = vld [vmem:[#allocation47_spill] sm:$0xff]  ;;  %v5436_v49 = vld [vmem:[#allocation69_spill] sm:$0xff] }
 0x1e6   :  { %2892 = vrot.lane.b32.xlu0 %v1541_v48, %s3698_s21  ;;  %v3392_v11 = vsel %vm3273_vm5, %v3391_v7, %v2665_v19  ;;  %v1576_v59 = vcombine.high %v1552_v41, %v1567_v39  ;;  %v3284_v37 = vsel %vm5327_vm10, %v3282_v51, %v4133_v55  ;;  %v1583_v18 = vrot.slane %v1575_v26, %v3768_v29  ;;  %v5437_v26 = vld [vmem:[#allocation9_spill] sm:$0xff] }
 0x1e7   :  { %2896 = vrot.lane.b32.xlu1 %v1524_v2, %s3692_s17  ;;  %v3286_v56 = vsel %vm5329_vm11, %v3284_v37, %v4139_v43  ;;  %v3336_v54 = vsel %vm5329_vm11, %v3335_v52, %v4306_v9  ;;  %v1544_v45 = vcombine.high %v1540_v1, %v3695_v25  ;;  %v3366_v55 = vsel %vm5327_vm10, %v3365_v13, %v4469_v3 }
 0x1e8   :  { %v2669_v36 = vpop.permute.xlu0 %2668  ;;  %v3337_v48 = vsel %vm5328_vm12, %v3336_v54, %v5428_v16  ;;  %v3367_v43 = vsel %vm5329_vm11, %v3366_v55, %v5429_v30  ;;  %v1591_v9 = vcombine.low %v1559_v24, %v4688_v27  ;;  %v3288_v7 = vsel %vm5328_vm12, %v3286_v56, %v5430_v44  ;;  %v5443_v54 = vld [vmem:[#allocation71_spill] sm:$0xff]  ;;  %v5444_v16 = vld [vmem:[#allocation32_spill] sm:$0xff] }
 0x1e9   :  { %v3393_v62 = vsel %vm5349_vm6, %v3392_v11, %v2669_v36  ;;  %v2673_v50 = vpop.permute.xlu1 %2672  ;;  %v1590_v19 = vrot.slane %v1576_v59, %v3768_v29  ;;  %v3290_v3 = vsel %vm5331_vm13, %v3288_v7, %v5431_v61  ;;  %v3338_v39 = vsel %vm5331_vm13, %v3337_v48, %v5432_v38  ;;  %v5446_v30 = vld [vmem:[#allocation52_spill] sm:$0xff] }
 0x1ea   :  { %2900 = vrot.lane.b32.xlu0 %v1542_v58, %s3696_s0  ;;  %v3394_v53 = vsel %vm5344_vm7, %v3393_v62, %v2673_v50  ;;  %v1607_v28 = vcombine.high %v1583_v18, %v3695_v25  ;;  %v3339_v11 = vsel %vm5330_vm14, %v3338_v39, %v5433_v6  ;;  %v5434_v58 = vld [vmem:[#allocation68_spill] sm:$0xff]  ;;  %v1592_v23 = vcombine.high %v1559_v24, %v4688_v27  ;;  %v5441_v27 = vld [vmem:[#allocation51_spill] sm:$0xff]  ;;  %v5442_v24 = vld [vmem:[#allocation70_spill] sm:$0xff] }
 0x1eb   :  { %2904 = vrot.lane.b32.xlu1 %v1533_v4, %s3697_s20  ;;  %v3368_v36 = vsel %vm5328_vm12, %v3367_v43, %v5434_v58  ;;  %v5435_v62 = vld [vmem:[#allocation8_spill] sm:$0xff]  ;;  %v4738_v32 = vrot.slane %v5437_v26, %v3754_v15  ;;  %v1599_v47 = vrot.slane %v1591_v9, %v3768_v29  ;;  %v5449_v58 = vld [vmem:[#allocation34_spill] sm:$0xff] }
 0x1ec   :  { %v2677_v17 = vpop.permute.xlu0 %2676  ;;  %v4730_v50 = vrot.slane %v5435_v62, %v3754_v15  ;;  %v3369_v63 = vsel %vm5331_vm13, %v3368_v36, %v5436_v49  ;;  %v1626_v56 = vcombine.high %v5435_v62, %v3695_v25  ;;  %v1606_v55 = vrot.slane %v1592_v23, %v3768_v29  ;;  %v5451_v49 = vld [vmem:[#allocation54_spill] sm:$0xff] }
 0x1ed   :  { %v3395_v46 = vsel %vm5346_vm8, %v3394_v53, %v2677_v17  ;;  %v2681_v5 = vpop.permute.xlu1 %2680  ;;  %v5439_v53 = vld [vmem:[#allocation31_spill] sm:$0xff]  ;;  %v3370_v59 = vsel %vm5330_vm14, %v3369_v63, %v5442_v24  ;;  %v1609_v7 = vcombine.high %v1599_v47, %v3695_v25 }
 0x1ee   :  { %2908 = vrot.lane.b32.xlu0 %v1543_v0, %s3699_s22  ;;  %v3396_v42 = vsel %vm5345_vm9, %v3395_v46, %v2681_v5  ;;  %v5440_v0 = vld [vmem:[#allocation50_spill] sm:$0xff]  ;;  %v1608_v5 = vcombine.high %v1590_v19, %v3695_v25 }
 0x1ef   :  { %2912 = vrot.lane.b32.xlu1 %v1540_v1, %s3700_s23  ;;  %v5438_v1 = vld [vmem:[#allocation30_spill] sm:$0xff]  ;;  %v3340_v52 = vsel %vm5337_vm15, %v3339_v11, %v5440_v0  ;;  %v1642_v11 = vcombine.high %v4738_v32, %v4730_v50 }
 0x1f0   :  { %v2685_v31 = vpop.permute.xlu0 %2684  ;;  %v3292_v51 = vsel %vm5330_vm14, %v3290_v3, %v5438_v1  ;;  %v5448_v3 = vld [vmem:[#allocation72_spill] sm:$0xff] }
 0x1f1   :  { %v3397_v2 = vsel %vm5327_vm10, %v3396_v42, %v2685_v31  ;;  %v2689_v34 = vpop.permute.xlu1 %2688  ;;  %vm5332_vm10 = vcmask 556032   ;;  %v3294_v17 = vsel %vm5337_vm15, %v3292_v51, %v5439_v53  ;;  %v3371_v42 = vsel %vm5337_vm15, %v3370_v59, %v5443_v54  ;;  %v5453_v53 = vld [vmem:[#allocation73_spill] sm:$0xff]  ;;  %v5459_v54 = vld [vmem:[#allocation74_spill] sm:$0xff] }
 0x1f2   :  { %2916 = vrot.lane.b32.xlu0 %v1544_v45, %s3701_s24  ;;  %v3398_v41 = vsel %vm5329_vm11, %v3397_v2, %v2689_v34  ;;  %v3341_v13 = vsel %vm5332_vm10, %v3340_v52, %v5441_v27  ;;  %vm5336_vm11 = vcmask 621568   ;;  %v1611_v31 = vcombine.high %v5437_v26, %v3695_v25  ;;  %v5445_v2 = vld [vmem:[#allocation33_spill] sm:$0xff]  ;;  %v5455_v52 = vld [vmem:[#allocation36_spill] sm:$0xff] }
 0x1f3   :  { %2920 = vrot.lane.b32.xlu1 %v1583_v18, %s3702_s25  ;;  %v1641_v45 = vcombine.low %v4738_v32, %v4730_v50  ;;  %v3296_v48 = vsel %vm5332_vm10, %v3294_v17, %v5444_v16  ;;  %v3372_v38 = vsel %vm5332_vm10, %v3371_v42, %v5448_v3  ;;  %v1610_v26 = vcombine.high %v1606_v55, %v3695_v25  ;;  %v5452_v50 = vld [vmem:[#allocation55_spill] sm:$0xff]  ;;  %v5457_v27 = vld [vmem:[#allocation56_spill] sm:$0xff]  ;;  %v5465_v3 = vld [vmem:[#allocation58_spill] sm:$0xff] }
 0x1f4   :  { %v2693_v4 = vpop.permute.xlu0 %2692  ;;  %v1625_v6 = vrot.slane %v1611_v31, %v3754_v15 }
 0x1f5   :  { %v3399_v10 = vsel %vm5328_vm12, %v3398_v41, %v2693_v4  ;;  %v2697_v40 = vpop.permute.xlu1 %2696  ;;  %vm5335_vm12 = vcmask 588800   ;;  %v4780_v4 = vrot.slane %v1626_v56, %v3754_v15 }
 0x1f6   :  { %2924 = vrot.lane.b32.xlu0 %v1607_v28, %s3703_s26  ;;  %v3400_v8 = vsel %vm5331_vm13, %v3399_v10, %v2697_v40  ;;  %v3298_v34 = vsel %vm5335_vm12, %v3296_v48, %v5445_v2  ;;  %v3342_v43 = vsel %vm5335_vm12, %v3341_v13, %v5446_v30  ;;  %vm5338_vm13 = vcmask 687104   ;;  %v5450_v40 = vld [vmem:[#allocation35_spill] sm:$0xff]  ;;  %v5461_v2 = vld [vmem:[#allocation10_spill] sm:$0xff] }
 0x1f7   :  { %2928 = vrot.lane.b32.xlu1 %v1590_v19, %s3704_s27  ;;  %v5447_v19 = vld [vmem:[#allocation53_spill] sm:$0xff]  ;;  %v3373_v28 = vsel %vm5335_vm12, %v3372_v38, %v4508_v57  ;;  %v3300_v36 = vsel %vm5336_vm11, %v3298_v34, %v5449_v58  ;;  %v1649_v10 = vrot.slane %v1641_v45, %v3768_v29  ;;  %v1657_v0 = vcombine.low %v1625_v6, %v4780_v4  ;;  %v5460_v48 = vld [vmem:[#allocation75_spill] sm:$0xff] }
 0x1f8   :  { %v2701_v46 = vpop.permute.xlu0 %2700  ;;  %v3343_v61 = vsel %vm5336_vm11, %v3342_v43, %v5447_v19  ;;  %v3374_v1 = vsel %vm5336_vm11, %v3373_v28, %v4511_v22  ;;  %v1658_v16 = vcombine.high %v1625_v6, %v4780_v4  ;;  %v1699_v34 = vrot.slane %v5461_v2, %v3754_v15  ;;  %v5462_v30 = vld [vmem:[#allocation11_spill] sm:$0xff] }
 0x1f9   :  { %v3401_v37 = vsel %vm5330_vm14, %v3400_v8, %v2701_v46  ;;  %v2705_v18 = vpop.permute.xlu1 %2704  ;;  %vm5339_vm14 = vcmask 654336   ;;  %v1673_v46 = vcombine.high %v1649_v10, %v3695_v25  ;;  %v1684_v43 = vrot.slane %v5462_v30, %v3754_v15  ;;  %v5464_v19 = vld [vmem:[#allocation39_spill] sm:$0xff] }
 0x1fa   :  { %2932 = vrot.lane.b32.xlu0 %v1608_v5, %s3705_s28  ;;  %v3402_v9 = vsel %vm5337_vm15, %v3401_v37, %v2705_v18  ;;  %v3302_v62 = vsel %vm5339_vm14, %v3300_v36, %v5450_v40  ;;  %v3344_v57 = vsel %vm5339_vm14, %v3343_v61, %v5451_v49  ;;  %v3375_v17 = vsel %vm5339_vm14, %v3374_v1, %v5453_v53  ;;  %v5456_v5 = vld [vmem:[#allocation37_spill] sm:$0xff]  ;;  %v5466_v28 = vld [vmem:[#allocation59_spill] sm:$0xff] }
 0x1fb   :  { %2936 = vrot.lane.b32.xlu1 %v1599_v47, %s3706_s29  ;;  %v3345_v32 = vsel %vm5338_vm13, %v3344_v57, %v5452_v50  ;;  %v3304_v8 = vsel %vm5338_vm13, %v3302_v62, %v5455_v52  ;;  %v1656_v37 = vrot.slane %v1642_v11, %v3768_v29  ;;  %v5458_v18 = vld [vmem:[#allocation57_spill] sm:$0xff]  ;;  %v3376_v42 = vsel %vm5338_vm13, %v3375_v17, %v5459_v54  ;;  %v5467_v11 = vld [vmem:[#allocation76_spill] sm:$0xff] }
 0x1fc   :  { %v2709_v44 = vpop.permute.xlu0 %2708  ;;  %vm5342_vm15 = vcmask 818176   ;;  %v1692_v40 = vcombine.high %v5461_v2, %v3695_v25  ;;  %v5468_v62 = vld [vmem:[#allocation77_spill] sm:$0xff]  ;;  %v1677_v57 = vcombine.high %v5462_v30, %v3695_v25  ;;  %v1672_v50 = vrot.slane %v1658_v16, %v3768_v29  ;;  %v5477_v2 = vld [vmem:[#allocation63_spill] sm:$0xff] }
 0x1fd   :  { %v3403_v39 = vsel %vm5332_vm10, %v3402_v9, %v2709_v44  ;;  %v2713_v41 = vpop.permute.xlu1 %2712  ;;  %vm5341_vm10 = vcmask 719872   ;;  %v5463_v9 = vld [vmem:[#allocation38_spill] sm:$0xff]  ;;  %v1674_v4 = vcombine.high %v1656_v37, %v3695_v25  ;;  %v5472_v52 = vld [vmem:[#allocation61_spill] sm:$0xff] }
 0x1fe   :  { %2940 = vrot.lane.b32.xlu0 %v1609_v7, %s3707_s30  ;;  %v3404_v63 = vsel %vm5335_vm12, %v3403_v39, %v2713_v41  ;;  %vm5340_vm12 = vcmask 752640   ;;  %v3306_v22 = vsel %vm5341_vm10, %v3304_v8, %v5456_v5  ;;  %v3346_v13 = vsel %vm5341_vm10, %v3345_v32, %v5457_v27  ;;  %v5470_v32 = vld [vmem:[#allocation41_spill] sm:$0xff] }
 0x1ff   :  { %2944 = vrot.lane.b32.xlu1 %v1606_v55, %s5333_s2  ;;  %s5454_s2 = smov 60   ;;  %v3347_v56 = vsel %vm5340_vm12, %v3346_v13, %v5458_v18  ;;  %v3377_v55 = vsel %vm5341_vm10, %v3376_v42, %v5460_v48  ;;  %v3308_v44 = vsel %vm5340_vm12, %v3306_v22, %v5463_v9  ;;  %v1665_v7 = vrot.slane %v1657_v0, %v3768_v29  ;;  %v5474_v18 = vld [vmem:[#allocation42_spill] sm:$0xff]  ;;  %v5475_v42 = vld [vmem:[#allocation43_spill] sm:$0xff] }
 0x200   :  { %v2717_v23 = vpop.permute.xlu0 %2716  ;;  %v3378_v58 = vsel %vm5340_vm12, %v3377_v55, %v5467_v11  ;;  %v1706_v13 = vrot.slane %v1692_v40, %v3754_v15  ;;  %v1676_v55 = vcombine.high %v1672_v50, %v3695_v25 }
 0x201   :  { %v3405_v51 = vsel %vm5336_vm11, %v3404_v63, %v2717_v23  ;;  %v2721_v47 = vpop.permute.xlu1 %2720  ;;  %vm5343_vm11 = vcmask 785408   ;;  %v1707_v63 = vcombine.low %v1684_v43, %v1699_v34  ;;  %v5469_v23 = vld [vmem:[#allocation40_spill] sm:$0xff]  ;;  %v1675_v0 = vcombine.high %v1665_v7, %v3695_v25 }
 0x202   :  { %2948 = vrot.lane.b32.xlu0 %v1610_v26, %s5454_s2  ;;  %v3406_v24 = vsel %vm5339_vm14, %v3405_v51, %v2721_v47  ;;  %v3310_v61 = vsel %vm5343_vm11, %v3308_v44, %v5464_v19  ;;  %v3348_v38 = vsel %vm5343_vm11, %v3347_v56, %v5465_v3  ;;  %vm3315_vm14 = vcmask 883712   ;;  %v5471_v51 = vld [vmem:[#allocation60_spill] sm:$0xff] }
 0x203   :  { %2952 = vrot.lane.b32.xlu1 %v1649_v10, %s3710_s4  ;;  %v3349_v6 = vsel %vm5342_vm15, %v3348_v38, %v5466_v28  ;;  %v3379_v49 = vsel %vm5343_vm11, %v3378_v58, %v5468_v62  ;;  %v3312_v26 = vsel %vm5342_vm15, %v3310_v61, %v5469_v23  ;;  %v1715_v54 = vrot.slane %v1707_v63, %v3768_v29  ;;  %v5478_v19 = vld [vmem:[#allocation12_spill] sm:$0xff]  ;;  %v5482_v58 = vld [vmem:[#allocation14_spill] sm:$0xff] }
 0x204   :  { %v2725_v59 = vpop.permute.xlu0 %2724  ;;  %v1765_v61 = vrot.slane %v5478_v19, %v3754_v15  ;;  %v5479_v3 = vld [vmem:[#allocation44_spill] sm:$0xff] }
 0x205   :  { %v3407_v31 = vsel %vm5338_vm13, %v3406_v24, %v2725_v59  ;;  %v2729_v45 = vpop.permute.xlu1 %2728  ;;  %vm3313_vm13 = vcmask 850944   ;;  %v1691_v59 = vrot.slane %v1677_v57, %v3754_v15  ;;  %v1739_v11 = vcombine.high %v1715_v54, %v3695_v25 }
 0x206   :  { %2956 = vrot.lane.b32.xlu0 %v1673_v46, %s3711_s5  ;;  %v3408_v39 = vsel %vm5341_vm10, %v3407_v31, %v2729_v45  ;;  %v3314_v1 = vsel %vm3313_vm13, %v3312_v26, %v5470_v32  ;;  %v3350_v47 = vsel %vm3313_vm13, %v3349_v6, %v5471_v51  ;;  %v5473_v46 = vld [vmem:[#allocation78_spill] sm:$0xff]  ;;  %vm5352_vm10 = vcmask 949248  }
 0x207   :  { %2960 = vrot.lane.b32.xlu1 %v1656_v37, %s5425_s3  ;;  %v3351_v8 = vsel %vm3315_vm14, %v3350_v47, %v5472_v52  ;;  %v3380_v5 = vsel %vm5342_vm15, %v3379_v49, %v5473_v46  ;;  %v1708_v37 = vcombine.high %v1684_v43, %v1699_v34  ;;  %v3316_v56 = vsel %vm3315_vm14, %v3314_v1, %v5474_v18  ;;  %v5476_v45 = vld [vmem:[#allocation62_spill] sm:$0xff] }
 0x208   :  { %v2733_v41 = vpop.permute.xlu0 %2732  ;;  %v3381_v24 = vsel %vm3313_vm13, %v3380_v5, %v4550_v20  ;;  %v1724_v23 = vcombine.high %v1691_v59, %v1706_v13  ;;  %v1758_v26 = vcombine.high %v5478_v19, %v3695_v25 }
 0x209   :  { %v3409_v36 = vsel %vm5340_vm12, %v3408_v39, %v2733_v41  ;;  %v2737_v10 = vpop.permute.xlu1 %2736  ;;  %vm3317_vm12 = vcmask 916480   ;;  %v3382_v30 = vsel %vm3315_vm14, %v3381_v24, %v4553_v21  ;;  %v1722_v21 = vrot.slane %v1708_v37, %v3768_v29  ;;  %v5480_v39 = vld [vmem:[#allocation45_spill] sm:$0xff]  ;;  %v5485_v24 = vld [vmem:[#allocation66_spill] sm:$0xff] }
 0x20a   :  { %2964 = vrot.lane.b32.xlu0 %v1674_v4, %s3713_s7  ;;  %v3410_v53 = vsel %vm5343_vm11, %v3409_v36, %v2737_v10  ;;  %v3318_v31 = vsel %vm3317_vm12, %v3316_v56, %v5475_v42  ;;  %v3352_v16 = vsel %vm3317_vm12, %v3351_v8, %v5476_v45  ;;  %vm5350_vm11 = vcmask 1014784   ;;  %v5481_v4 = vld [vmem:[#allocation64_spill] sm:$0xff]  ;;  %v5483_v10 = vld [vmem:[#allocation65_spill] sm:$0xff] }
 0x20b   :  { %2968 = vrot.lane.b32.xlu1 %v1665_v7, %s3714_s8  ;;  %v3353_v34 = vsel %vm5352_vm10, %v3352_v16, %v5477_v2  ;;  %v3383_v44 = vsel %vm3317_vm12, %v3382_v30, %v4562_v60  ;;  %v1723_v7 = vcombine.low %v1691_v59, %v1706_v13  ;;  %v3320_v38 = vsel %vm5352_vm10, %v3318_v31, %v5479_v3  ;;  %v5487_v3 = vld [vmem:[#allocation16_spill] sm:$0xff] }
 0x20c   :  { %v2741_v17 = vpop.permute.xlu0 %2740  ;;  %v1750_v36 = vrot.slane %v5482_v58, %v3754_v15  ;;  %v3384_v62 = vsel %vm5352_vm10, %v3383_v44, %v4564_v35  ;;  %v1740_v47 = vcombine.high %v1722_v21, %v3695_v25  ;;  %v1772_v5 = vrot.slane %v1758_v26, %v3754_v15  ;;  %v5486_v44 = vld [vmem:[#allocation13_spill] sm:$0xff] }
 0x20d   :  { %v3411_v22 = vsel %vm5342_vm15, %v3410_v53, %v2741_v17  ;;  %v2745_v27 = vpop.permute.xlu1 %2744  ;;  %vm5351_vm15 = vcmask 982016   ;;  %v1731_v53 = vrot.slane %v1723_v7, %v3768_v29  ;;  %v1831_v7 = vrot.slane %v5486_v44, %v3754_v15 }
 0x20e   :  { %2972 = vrot.lane.b32.xlu0 %v1675_v0, %s5408_s6  ;;  %v3412_v20 = vsel %vm3313_vm13, %v3411_v22, %v2745_v27  ;;  %v3322_v41 = vsel %vm5351_vm15, %v3320_v38, %v5480_v39  ;;  %v3354_v28 = vsel %vm5351_vm15, %v3353_v34, %v5481_v4  ;;  %v3385_v63 = vsel %vm5351_vm15, %v3384_v62, %v4576_v33 }
 0x20f   :  { %2976 = vrot.lane.b32.xlu1 %v1672_v50, %s3716_s10  ;;  %v3355_v40 = vsel %vm5350_vm11, %v3354_v28, %v5483_v10  ;;  %v5484_v50 = vld [vmem:[#allocation46_spill] sm:$0xff]  ;;  %v1743_v33 = vcombine.high %v5482_v58, %v3695_v25  ;;  %v1773_v17 = vcombine.low %v1750_v36, %v1765_v61  ;;  %v3386_v0 = vsel %vm5350_vm11, %v3385_v63, %v4583_v14 }
 0x210   :  { %v2749_v48 = vpop.permute.xlu0 %2748  ;;  %v3324_v32 = vsel %vm5350_vm11, %v3322_v41, %v5484_v50  ;;  %v1738_v22 = vrot.slane %v1724_v23, %v3768_v29  ;;  %v1741_v37 = vcombine.high %v1731_v53, %v3695_v25  ;;  %v1774_v56 = vcombine.high %v1750_v36, %v1765_v61 }
 0x211   :  { %v3413_v43 = vsel %vm3315_vm14, %v3412_v20, %v2749_v48  ;;  %v2753_v9 = vpop.permute.xlu1 %2752  ;;  %v3550_v1 = vcombine.low %v3324_v32, %v3355_v40  ;;  %v1757_v18 = vrot.slane %v1743_v33, %v3754_v15  ;;  %v1816_v38 = vrot.slane %v5487_v3, %v3754_v15 }
 0x212   :  { %2980 = vrot.lane.b32.xlu0 %v1676_v55, %s3717_s11  ;;  %v3414_v60 = vsel %vm3317_vm12, %v3413_v43, %v2753_v9  ;;  %v1742_v48 = vcombine.high %v1738_v22, %v3695_v25  ;;  %v1788_v43 = vrot.slane %v1774_v56, %v3768_v29  ;;  %v1824_v28 = vcombine.high %v5486_v44, %v3695_v25 }
 0x213   :  { %2984 = vrot.lane.b32.xlu1 %v1715_v54, %s5391_s9  ;;  %v3558_v27 = vrot.slane %v3550_v1, %v3754_v15  ;;  %v4936_v54 = vrot.slane %v1773_v17, %v3768_v29  ;;  %v1789_v55 = vcombine.low %v1757_v18, %v1772_v5  ;;  %v1790_v9 = vcombine.high %v1757_v18, %v1772_v5 }
 0x214   :  { %v2757_v6 = vpop.permute.xlu0 %2756  ;;  %v1806_v41 = vcombine.high %v1788_v43, %v3695_v25  ;;  %v1839_v58 = vcombine.low %v1816_v38, %v1831_v7  ;;  %v1840_v26 = vcombine.high %v1816_v38, %v1831_v7 }
 0x215   :  { %v3415_v49 = vsel %vm5352_vm10, %v3414_v60, %v2757_v6  ;;  %v2761_v57 = vpop.permute.xlu1 %2760  ;;  %v1805_v30 = vcombine.high %v4936_v54, %v3695_v25  ;;  %v1797_v4 = vrot.slane %v1789_v55, %v3768_v29  ;;  %v1809_v60 = vcombine.high %v5487_v3, %v3695_v25 }
 0x216   :  { %2988 = vrot.lane.b32.xlu0 %v1739_v11, %s3719_s13  ;;  %v3416_v35 = vsel %vm5351_vm15, %v3415_v49, %v2761_v57  ;;  %v1804_v62 = vrot.slane %v1790_v9, %v3768_v29  ;;  %v1838_v49 = vrot.slane %v1824_v28, %v3754_v15 }
 0x217   :  { %2992 = vrot.lane.b32.xlu1 %v1722_v21, %s3720_s14  ;;  %v1807_v40 = vcombine.high %v1797_v4, %v3695_v25  ;;  %v1823_v57 = vrot.slane %v1809_v60, %v3754_v15 }
 0x218   :  { %v2765_v51 = vpop.permute.xlu0 %2764  ;;  %v1808_v1 = vcombine.high %v1804_v62, %v3695_v25 }
 0x219   :  { %v3417_v52 = vsel %vm5350_vm11, %v3416_v35, %v2765_v51  ;;  %v2769_v8 = vpop.permute.xlu1 %2768  ;;  %v1847_v35 = vrot.slane %v1839_v58, %v3768_v29  ;;  %v1855_v51 = vcombine.low %v1823_v57, %v1838_v49 }
 0x21a   :  { %v3551_v46 = vcombine.low %v3386_v0, %v3417_v52  ;;  %2996 = vrot.lane.b32.xlu0 %v1740_v47, %s3721_s15  ;;  %v3418_v59 = vsel %vm3263_vm0, %v5485_v24, %v2769_v8  ;;  %v5488_v47 = vld [vmem:[#allocation18_spill] sm:$0xff]  ;;  %v5490_v0 = vld [vmem:[#allocation23_spill] sm:$0xff] }
 0x21b   :  { %3000 = vrot.lane.b32.xlu1 %v1731_v53, %s5372_s12  ;;  %v2029_v53 = vrot.slane %v5488_v47, %v3754_v15  ;;  %v2014_v52 = vrot.slane %v5490_v0, %v3754_v15  ;;  %v1871_v5 = vcombine.high %v1847_v35, %v3695_v25 }
 0x21c   :  { %v3565_v13 = vrot.slane %v3551_v46, %v3754_v15  ;;  %v2773_v14 = vpop.permute.xlu0 %2772 }
 0x21d   :  { %v3419_v42 = vsel %vm3265_vm1, %v3418_v59, %v2773_v14  ;;  %v2777_v31 = vpop.permute.xlu1 %2776  ;;  %v2037_v14 = vcombine.low %v2014_v52, %v2029_v53  ;;  %v2038_v55 = vcombine.high %v2014_v52, %v2029_v53 }
 0x21e   :  { %3004 = vrot.lane.b32.xlu0 %v1741_v37, %s3723_s18  ;;  %v3566_v45 = vcombine.low %v3558_v27, %v3565_v13  ;;  %v3420_v16 = vsel %vm3267_vm2, %v3419_v42, %v2777_v31  ;;  %v2022_v27 = vcombine.high %v5488_v47, %v3695_v25  ;;  %v2007_v13 = vcombine.high %v5490_v0, %v3695_v25 }
 0x21f   :  { %3008 = vrot.lane.b32.xlu1 %v1738_v22, %s3724_s19  ;;  %v1854_v22 = vrot.slane %v1840_v26, %v3768_v29  ;;  %v1863_v42 = vrot.slane %v1855_v51, %v3768_v29  ;;  %v1856_v31 = vcombine.high %v1823_v57, %v1838_v49 }
 0x220   :  { %v2781_v20 = vpop.permute.xlu0 %2780  ;;  %3586 = vst [vmem:[#allocation5] sm:$0xff] %v3566_v45  ;;  %v2036_v45 = vrot.slane %v2022_v27, %v3754_v15 }
 0x221   :  { %v3421_v2 = vsel %vm3269_vm3, %v3420_v16, %v2781_v20  ;;  %v2785_v34 = vpop.permute.xlu1 %2784  ;;  %v1872_v56 = vcombine.high %v1854_v22, %v3695_v25  ;;  %v2021_v16 = vrot.slane %v2007_v13, %v3754_v15  ;;  %v5009_v7 = vrot.slane %v1856_v31, %v3768_v29 }
 0x222   :  { %3012 = vrot.lane.b32.xlu0 %v1742_v48, %s5347_s16  ;;  %v3422_v19 = vsel %vm3271_vm4, %v3421_v2, %v2785_v34  ;;  %v5001_v2 = vrot.slane %v2037_v14, %v3768_v29  ;;  %s5498_s16 = smov 56  }
 0x223   :  { %3016 = vrot.lane.b32.xlu1 %v1805_v30, %s3698_s21 }
 0x224   :  { %v2789_v61 = vpop.permute.xlu0 %2788  ;;  %v2069_v38 = vcombine.high %v5001_v2, %v3695_v25 }
 0x225   :  { %v3423_v21 = vsel %vm3273_vm5, %v3422_v19, %v2789_v61  ;;  %v2793_v39 = vpop.permute.xlu1 %2792  ;;  %v2053_v19 = vcombine.low %v2021_v16, %v2036_v45 }
 0x226   :  { %3020 = vrot.lane.b32.xlu0 %v1788_v43, %s3692_s17  ;;  %v3424_v6 = vsel %vm5349_vm6, %v3423_v21, %v2793_v39  ;;  %v1873_v43 = vcombine.high %v1863_v42, %v3695_v25  ;;  %v2052_v21 = vrot.slane %v2038_v55, %v3768_v29  ;;  %v2054_v39 = vcombine.high %v2021_v16, %v2036_v45 }
 0x227   :  { %3024 = vrot.lane.b32.xlu1 %v1806_v41, %s3696_s0  ;;  %v5499_v41 = vld [vmem:[#allocation20_spill] sm:$0xff] }
 0x228   :  { %v2797_v11 = vpop.permute.xlu0 %2796 }
 0x229   :  { %v3425_v36 = vsel %vm5344_vm7, %v3424_v6, %v2797_v11  ;;  %v2801_v10 = vpop.permute.xlu1 %2800  ;;  %vm5489_vm7 = vcmask 359424   ;;  %v5501_v6 = vld [vmem:[#allocation25_spill] sm:$0xff] }
 0x22a   :  { %3028 = vrot.lane.b32.xlu0 %v1797_v4, %s3697_s20  ;;  %v3426_v63 = vsel %vm5346_vm8, %v3425_v36, %v2801_v10  ;;  %vm5494_vm8 = vcmask 490496   ;;  %v2095_v4 = vrot.slane %v5499_v41, %v3754_v15  ;;  %v2080_v11 = vrot.slane %v5501_v6, %v3754_v15 }
 0x22b   :  { %3032 = vrot.lane.b32.xlu1 %v1807_v40, %s3699_s22  ;;  %v2070_v10 = vcombine.high %v2052_v21, %v3695_v25  ;;  %v2061_v40 = vrot.slane %v2053_v19, %v3768_v29  ;;  %v2073_v49 = vcombine.high %v5501_v6, %v3695_v25  ;;  %v1874_v6 = vcombine.high %v5009_v7, %v3695_v25 }
 0x22c   :  { %v2805_v23 = vpop.permute.xlu0 %2804 }
 0x22d   :  { %v3427_v50 = vsel %vm5345_vm9, %v3426_v63, %v2805_v23  ;;  %v2809_v32 = vpop.permute.xlu1 %2808  ;;  %vm5491_vm9 = vcmask 392192   ;;  %v2103_v23 = vcombine.low %v2080_v11, %v2095_v4  ;;  %v2087_v51 = vrot.slane %v2073_v49, %v3754_v15 }
 0x22e   :  { %3036 = vrot.lane.b32.xlu0 %v1804_v62, %s3700_s23  ;;  %v3428_v33 = vsel %vm5489_vm7, %v3427_v50, %v2809_v32  ;;  %vm5492_vm7 = vcmask 424960   ;;  %v2088_v62 = vcombine.high %v5499_v41, %v3695_v25  ;;  %v2071_v32 = vcombine.high %v2061_v40, %v3695_v25 }
 0x22f   :  { %3040 = vrot.lane.b32.xlu1 %v1808_v1, %s3701_s24  ;;  %v2068_v1 = vrot.slane %v2054_v39, %v3768_v29 }
 0x230   :  { %v2813_v17 = vpop.permute.xlu0 %2812 }
 0x231   :  { %v3429_v8 = vsel %vm5491_vm9, %v3428_v33, %v2813_v17  ;;  %v2817_v46 = vpop.permute.xlu1 %2816  ;;  %vm5493_vm9 = vcmask 457728   ;;  %v2104_v33 = vcombine.high %v2080_v11, %v2095_v4  ;;  %v2072_v52 = vcombine.high %v2068_v1, %v3695_v25 }
 0x232   :  { %3044 = vrot.lane.b32.xlu0 %v1847_v35, %s3702_s25  ;;  %v3430_v24 = vsel %vm5492_vm7, %v3429_v8, %v2817_v46  ;;  %vm5495_vm7 = vcmask 523264   ;;  %v2102_v35 = vrot.slane %v2088_v62, %v3754_v15  ;;  %v2111_v8 = vrot.slane %v2103_v23, %v3768_v29 }
 0x233   :  { %3048 = vrot.lane.b32.xlu1 %v1871_v5, %s3703_s26 }
 0x234   :  { %v2821_v59 = vpop.permute.xlu0 %2820  ;;  %v2120_v16 = vcombine.high %v2087_v51, %v2102_v35 }
 0x235   :  { %v3431_v37 = vsel %vm5493_vm9, %v3430_v24, %v2821_v59  ;;  %v2825_v18 = vpop.permute.xlu1 %2824  ;;  %vm5496_vm9 = vcmask 556032   ;;  %v2135_v24 = vcombine.high %v2111_v8, %v3695_v25  ;;  %v2118_v59 = vrot.slane %v2104_v33, %v3768_v29 }
 0x236   :  { %3052 = vrot.lane.b32.xlu0 %v1854_v22, %s3704_s27  ;;  %v3432_v20 = vsel %vm5494_vm8, %v3431_v37, %v2825_v18  ;;  %vm5497_vm8 = vcmask 588800   ;;  %v2119_v22 = vcombine.low %v2087_v51, %v2102_v35  ;;  %v2134_v41 = vrot.slane %v2120_v16, %v3768_v29 }
 0x237   :  { %3056 = vrot.lane.b32.xlu1 %v1872_v56, %s3705_s28 }
 0x238   :  { %v2829_v48 = vpop.permute.xlu0 %2828  ;;  %v2127_v31 = vrot.slane %v2119_v22, %v3768_v29 }
 0x239   :  { %v3433_v34 = vsel %vm5495_vm7, %v3432_v20, %v2829_v48  ;;  %v2833_v30 = vpop.permute.xlu1 %2832  ;;  %vm5500_vm7 = vcmask 621568   ;;  %v5508_v48 = vld [vmem:[#allocation15_spill] sm:$0xff] }
 0x23a   :  { %3060 = vrot.lane.b32.xlu0 %v1863_v42, %s3706_s29  ;;  %v3434_v9 = vsel %vm5496_vm9, %v3433_v34, %v2833_v30  ;;  %vm5502_vm9 = vcmask 654336   ;;  %v2136_v42 = vcombine.high %v2118_v59, %v3695_v25  ;;  %v1897_v55 = vrot.slane %v5508_v48, %v3754_v15  ;;  %v5509_v34 = vld [vmem:[#allocation19_spill] sm:$0xff] }
 0x23b   :  { %3064 = vrot.lane.b32.xlu1 %v1873_v43, %s3707_s30  ;;  %v1882_v30 = vrot.slane %v5509_v34, %v3754_v15  ;;  %v1875_v23 = vcombine.high %v5509_v34, %v3695_v25 }
 0x23c   :  { %v2837_v44 = vpop.permute.xlu0 %2836 }
 0x23d   :  { %v3435_v61 = vsel %vm5497_vm8, %v3434_v9, %v2837_v44  ;;  %v2841_v3 = vpop.permute.xlu1 %2840  ;;  %vm5503_vm8 = vcmask 687104   ;;  %v2137_v44 = vcombine.high %v2127_v31, %v3695_v25  ;;  %v1905_v4 = vcombine.low %v1882_v30, %v1897_v55 }
 0x23e   :  { %3068 = vrot.lane.b32.xlu0 %v5009_v7, %s5498_s16  ;;  %v3436_v28 = vsel %vm5500_vm7, %v3435_v61, %v2841_v3  ;;  %vm5504_vm7 = vcmask 719872   ;;  %v5510_v61 = vld [vmem:[#allocation22_spill] sm:$0xff]  ;;  %v1890_v7 = vcombine.high %v5508_v48, %v3695_v25 }
 0x23f   :  { %3140 = vrot.lane.b32.xlu1 %v2069_v38, %s3698_s21  ;;  %v2161_v3 = vrot.slane %v5510_v61, %v3754_v15  ;;  %v5511_v38 = vld [vmem:[#allocation26_spill] sm:$0xff]  ;;  %v1913_v49 = vrot.slane %v1905_v4, %v3768_v29  ;;  %v2154_v51 = vcombine.high %v5510_v61, %v3695_v25  ;;  %v5519_v4 = vld [vmem:[#allocation17_spill] sm:$0xff] }
 0x240   :  { %v2845_v60 = vpop.permute.xlu0 %2844 }
 0x241   :  { %v3437_v58 = vsel %vm5502_vm9, %v3436_v28, %v2845_v60  ;;  %v2849_v36 = vpop.permute.xlu1 %2848  ;;  %vm5505_vm9 = vcmask 752640  }
 0x242   :  { %3144 = vrot.lane.b32.xlu0 %v2052_v21, %s3692_s17  ;;  %v3438_v57 = vsel %vm5503_vm8, %v3437_v58, %v2849_v36  ;;  %vm5506_vm8 = vcmask 785408   ;;  %v2146_v21 = vrot.slane %v5511_v38, %v3754_v15  ;;  %s5534_s17 = smov 124  }
 0x243   :  { %3148 = vrot.lane.b32.xlu1 %v2070_v10, %s3696_s0  ;;  %v2138_v10 = vcombine.high %v2134_v41, %v3695_v25  ;;  %s3726_s0 = smov [#allocation5]  }
 0x244   :  { %v2853_v63 = vpop.permute.xlu0 %2852  ;;  %v2169_v58 = vcombine.low %v2146_v21, %v2161_v3 }
 0x245   :  { %v3439_v26 = vsel %vm5504_vm7, %v3438_v57, %v2853_v63  ;;  %v2857_v50 = vpop.permute.xlu1 %2856  ;;  %vm5507_vm7 = vcmask 818176  }
 0x246   :  { %3152 = vrot.lane.b32.xlu0 %v2061_v40, %s3697_s20  ;;  %v3440_v47 = vsel %vm5505_vm9, %v3439_v26, %v2857_v50  ;;  %v2177_v63 = vrot.slane %v2169_v58, %v3768_v29  ;;  %v1906_v26 = vcombine.high %v1882_v30, %v1897_v55  ;;  %vm5512_vm9 = vcmask 261120   ;;  %s3594_s20 = sshll.u32 %s3726_s0, 4  ;;  %s3595_s20 = int_to_ptr.vmem [resolvable:$true] %s3594_s20 }
 0x247   :  { %3156 = vrot.lane.b32.xlu1 %v2071_v32, %s3699_s22  ;;  %s3664_s21 = scalar_lea.vmem %s3595_s20, 256  ;;  %p3669_p9 = scmp.lt.s32.totalorder %s3595_s20, %s3595_s20 }
 0x248   :  { %v2861_v53 = vpop.permute.xlu0 %2860  ;;  %p3665_p8 = scmp.ne.s32.totalorder %s3595_s20, %s3664_s21  ;;  %p3670_p10 = scmp.lt.s32.totalorder %s3664_s21, %s3664_s21 }
 0x249   :  { %v3441_v17 = vsel %vm5506_vm8, %v3440_v47, %v2861_v53  ;;  %v2865_v0 = vpop.permute.xlu1 %2864  ;;  %v2139_v47 = vcombine.high %v5511_v38, %v3695_v25  ;;  %v2170_v53 = vcombine.high %v2146_v21, %v2161_v3  ;;  %vm5513_vm8 = vcmask 293888  }
 0x24a   :  { %3160 = vrot.lane.b32.xlu0 %v2068_v1, %s3700_s23  ;;  %v3442_v46 = vsel %vm5507_vm7, %v3441_v17, %v2865_v0  ;;  %v1937_v1 = vcombine.high %v1913_v49, %v3695_v25  ;;  %v2201_v17 = vcombine.high %v2177_v63, %v3695_v25  ;;  %v1904_v0 = vrot.slane %v1890_v7, %v3754_v15  ;;  %p3671_p11 = por %p3670_p10, %p3669_p9 }
 0x24b   :  { %3164 = vrot.lane.b32.xlu1 %v2072_v52, %s3701_s24  ;;  %v1889_v52 = vrot.slane %v1875_v23, %v3754_v15  ;;  %vm5514_vm7 = vcmask 326656  }
 0x24c   :  { %v2869_v5 = vpop.permute.xlu0 %2868  ;;  %p3672_p12 = pnand %p3671_p11, %p3665_p8 }
 0x24d   :  { %v3443_v27 = vsel %vm3313_vm13, %v3442_v46, %v2869_v5  ;;  %v2873_v13 = vpop.permute.xlu1 %2872  ;;  %v1920_v5 = vrot.slane %v1906_v26, %v3768_v29 }
 0x24e   :  { %3168 = vrot.lane.b32.xlu0 %v2111_v8, %s3702_s25  ;;  %v3444_v14 = vsel %vm3315_vm14, %v3443_v27, %v2873_v13  ;;  %v2168_v27 = vrot.slane %v2154_v51, %v3754_v15  ;;  %v2153_v13 = vrot.slane %v2139_v47, %v3754_v15 }
 0x24f   :  { %3172 = vrot.lane.b32.xlu1 %v2135_v24, %s3703_s26 }
 0x250   :  { %v2877_v37 = vpop.permute.xlu0 %2876  ;;  %v2186_v21 = vcombine.high %v2153_v13, %v2168_v27 }
 0x251   :  { %v3445_v18 = vsel %vm3317_vm12, %v3444_v14, %v2877_v37  ;;  %v2881_v56 = vpop.permute.xlu1 %2880  ;;  %v1921_v14 = vcombine.low %v1889_v52, %v1904_v0 }
 0x252   :  { %v3446_v45 = vsel %vm5352_vm10, %v3445_v18, %v2881_v56  ;;  %3176 = vrot.lane.b32.xlu0 %v2118_v59, %s3704_s27  ;;  %v2184_v59 = vrot.slane %v2170_v53, %v3768_v29  ;;  %v1938_v56 = vcombine.high %v1920_v5, %v3695_v25 }
 0x253   :  { %3180 = vrot.lane.b32.xlu1 %v2136_v42, %s3705_s28  ;;  %v1929_v55 = vrot.slane %v1921_v14, %v3768_v29 }
 0x254   :  { %v2885_v20 = vpop.permute.xlu0 %2884  ;;  %v2202_v16 = vcombine.high %v2184_v59, %v3695_v25 }
 0x255   :  { %v3447_v43 = vsel %vm5351_vm15, %v3446_v45, %v2885_v20  ;;  %v2889_v9 = vpop.permute.xlu1 %2888  ;;  %v1939_v3 = vcombine.high %v1929_v55, %v3695_v25 }
 0x256   :  { %v5066_v19 = vsel %vm5350_vm11, %v3447_v43, %v2889_v9  ;;  %3184 = vrot.lane.b32.xlu0 %v2127_v31, %s3706_s29  ;;  %v2185_v31 = vcombine.low %v2153_v13, %v2168_v27  ;;  %v1922_v9 = vcombine.high %v1889_v52, %v1904_v0  ;;  %v1956_v0 = vcombine.high %v5519_v4, %v3695_v25 }
 0x257   :  { %3188 = vrot.lane.b32.xlu1 %v2137_v44, %s3707_s30 }
 0x258   :  { %v2893_v39 = vpop.permute.xlu0 %2892  ;;  %v2193_v43 = vrot.slane %v2185_v31, %v3768_v29 }
 0x259   :  { %v3449_v28 = vsel %vm3263_vm0, %v4615_v12, %v2893_v39  ;;  %v2897_v60 = vpop.permute.xlu1 %2896 }
 0x25a   :  { %v3450_v11 = vsel %vm3265_vm1, %v3449_v28, %v2897_v60  ;;  %3192 = vrot.lane.b32.xlu0 %v2134_v41, %s5498_s16  ;;  %v2203_v41 = vcombine.high %v2193_v43, %v3695_v25  ;;  %v1963_v28 = vrot.slane %v5519_v4, %v3754_v15  ;;  %v5520_v60 = vld [vmem:[#allocation21_spill] sm:$0xff] }
 0x25b   :  { %3072 = vrot.lane.b32.xlu1 %v1874_v6, %s5454_s2  ;;  %v1948_v6 = vrot.slane %v5520_v60, %v3754_v15 }
 0x25c   :  { %v2901_v36 = vpop.permute.xlu0 %2900 }
 0x25d   :  { %v3451_v40 = vsel %vm3267_vm2, %v3450_v11, %v2901_v36  ;;  %v2905_v62 = vpop.permute.xlu1 %2904  ;;  %v1936_v36 = vrot.slane %v1922_v9, %v3768_v29 }
 0x25e   :  { %v3452_v12 = vsel %vm3269_vm3, %v3451_v40, %v2905_v62  ;;  %3196 = vrot.lane.b32.xlu0 %v2138_v10, %s5454_s2  ;;  %v5523_v40 = vld [vmem:[#allocation24_spill] sm:$0xff] }
 0x25f   :  { %3076 = vrot.lane.b32.xlu1 %v1913_v49, %s3710_s4  ;;  %v2227_v62 = vrot.slane %v5523_v40, %v3754_v15  ;;  %v5524_v49 = vld [vmem:[#allocation27_spill] sm:$0xff] }
 0x260   :  { %v2909_v57 = vpop.permute.xlu0 %2908  ;;  %v2205_v14 = vcombine.high %v5524_v49, %v3695_v25 }
 0x261   :  { %v3453_v50 = vsel %vm3271_vm4, %v3452_v12, %v2909_v57  ;;  %v2913_v32 = vpop.permute.xlu1 %2912  ;;  %v2212_v12 = vrot.slane %v5524_v49, %v3754_v15  ;;  %v2200_v57 = vrot.slane %v2186_v21, %v3768_v29 }
 0x262   :  { %v3454_v35 = vsel %vm3273_vm5, %v3453_v50, %v2913_v32  ;;  %3200 = vrot.lane.b32.xlu0 %v2177_v63, %s3710_s4  ;;  %v1971_v63 = vcombine.low %v1948_v6, %v1963_v28  ;;  %v1940_v50 = vcombine.high %v1936_v36, %v3695_v25 }
 0x263   :  { %3080 = vrot.lane.b32.xlu1 %v1937_v1, %s3711_s5  ;;  %v2235_v1 = vcombine.low %v2212_v12, %v2227_v62  ;;  %v2204_v51 = vcombine.high %v2200_v57, %v3695_v25 }
 0x264   :  { %v2917_v33 = vpop.permute.xlu0 %2916 }
 0x265   :  { %v3455_v8 = vsel %vm5349_vm6, %v3454_v35, %v2917_v33  ;;  %v2921_v46 = vpop.permute.xlu1 %2920  ;;  %vm5516_vm6 = vcmask 392192   ;;  %v1979_v33 = vrot.slane %v1971_v63, %v3768_v29 }
 0x266   :  { %v3456_v22 = vsel %vm5512_vm9, %v3455_v8, %v2921_v46  ;;  %3204 = vrot.lane.b32.xlu0 %v2201_v17, %s3711_s5  ;;  %vm5515_vm9 = vcmask 359424   ;;  %v2243_v8 = vrot.slane %v2235_v1, %v3768_v29  ;;  %v1941_v46 = vcombine.high %v5520_v60, %v3695_v25 }
 0x267   :  { %3084 = vrot.lane.b32.xlu1 %v1920_v5, %s5425_s3  ;;  %v1972_v5 = vcombine.high %v1948_v6, %v1963_v28  ;;  %v2003_v13 = vcombine.high %v1979_v33, %v3695_v25 }
 0x268   :  { %v2925_v24 = vpop.permute.xlu0 %2924  ;;  %v1955_v31 = vrot.slane %v1941_v46, %v3754_v15 }
 0x269   :  { %v3457_v37 = vsel %vm5513_vm8, %v3456_v22, %v2925_v24  ;;  %v2929_v18 = vpop.permute.xlu1 %2928  ;;  %vm5517_vm8 = vcmask 424960  }
 0x26a   :  { %v3458_v42 = vsel %vm5514_vm7, %v3457_v37, %v2929_v18  ;;  %3208 = vrot.lane.b32.xlu0 %v2184_v59, %s5425_s3  ;;  %vm5518_vm7 = vcmask 457728   ;;  %v2220_v59 = vcombine.high %v5523_v40, %v3695_v25  ;;  %v2236_v37 = vcombine.high %v2212_v12, %v2227_v62 }
 0x26b   :  { %3088 = vrot.lane.b32.xlu1 %v1938_v56, %s3713_s7  ;;  %v2267_v56 = vcombine.high %v2243_v8, %v3695_v25 }
 0x26c   :  { %v2933_v45 = vpop.permute.xlu0 %2932 }
 0x26d   :  { %v3459_v20 = vsel %vm5515_vm9, %v3458_v42, %v2933_v45  ;;  %v2937_v48 = vpop.permute.xlu1 %2936  ;;  %vm5522_vm9 = vcmask 523264   ;;  %v1970_v42 = vrot.slane %v1956_v0, %v3754_v15 }
 0x26e   :  { %v3460_v34 = vsel %vm5516_vm6, %v3459_v20, %v2937_v48  ;;  %3212 = vrot.lane.b32.xlu0 %v2202_v16, %s3713_s7  ;;  %vm5521_vm6 = vcmask 490496   ;;  %v1986_v20 = vrot.slane %v1972_v5, %v3768_v29 }
 0x26f   :  { %3092 = vrot.lane.b32.xlu1 %v1929_v55, %s3714_s8  ;;  %v2234_v55 = vrot.slane %v2220_v59, %v3754_v15  ;;  %v1987_v9 = vcombine.low %v1955_v31, %v1970_v42 }
 0x270   :  { %v2941_v30 = vpop.permute.xlu0 %2940 }
 0x271   :  { %v3461_v44 = vsel %vm5517_vm8, %v3460_v34, %v2941_v30  ;;  %v2945_v61 = vpop.permute.xlu1 %2944  ;;  %vm5525_vm8 = vcmask 556032   ;;  %v2219_v34 = vrot.slane %v2205_v14, %v3754_v15  ;;  %v1995_v60 = vrot.slane %v1987_v9, %v3768_v29 }
 0x272   :  { %v3462_v38 = vsel %vm5518_vm7, %v3461_v44, %v2945_v61  ;;  %3216 = vrot.lane.b32.xlu0 %v2193_v43, %s3714_s8  ;;  %vm5526_vm7 = vcmask 588800   ;;  %v2250_v43 = vrot.slane %v2236_v37, %v3768_v29 }
 0x273   :  { %3096 = vrot.lane.b32.xlu1 %v1939_v3, %s5408_s6  ;;  %v2004_v3 = vcombine.high %v1986_v20, %v3695_v25  ;;  %v2251_v21 = vcombine.low %v2219_v34, %v2234_v55  ;;  %v2005_v62 = vcombine.high %v1995_v60, %v3695_v25  ;;  %v2252_v12 = vcombine.high %v2219_v34, %v2234_v55 }
 0x274   :  { %v2949_v39 = vpop.permute.xlu0 %2948 }
 0x275   :  { %v3463_v11 = vsel %vm5521_vm6, %v3462_v38, %v2949_v39  ;;  %v2953_v58 = vpop.permute.xlu1 %2952  ;;  %vm5527_vm6 = vcmask 621568  }
 0x276   :  { %v3464_v10 = vsel %vm5522_vm9, %v3463_v11, %v2953_v58  ;;  %3220 = vrot.lane.b32.xlu0 %v2203_v41, %s5408_s6  ;;  %vm5528_vm9 = vcmask 654336   ;;  %v2268_v41 = vcombine.high %v2250_v43, %v3695_v25  ;;  %v2259_v58 = vrot.slane %v2251_v21, %v3768_v29 }
 0x277   :  { %3100 = vrot.lane.b32.xlu1 %v1936_v36, %s3716_s10  ;;  %v1988_v36 = vcombine.high %v1955_v31, %v1970_v42 }
 0x278   :  { %v2957_v7 = vpop.permute.xlu0 %2956 }
 0x279   :  { %v3465_v23 = vsel %vm5525_vm8, %v3464_v10, %v2957_v7  ;;  %v2961_v26 = vpop.permute.xlu1 %2960  ;;  %vm5529_vm8 = vcmask 687104  }
 0x27a   :  { %v3466_v32 = vsel %vm5526_vm7, %v3465_v23, %v2961_v26  ;;  %3224 = vrot.lane.b32.xlu0 %v2200_v57, %s3716_s10  ;;  %vm5530_vm7 = vcmask 719872   ;;  %v2269_v57 = vcombine.high %v2259_v58, %v3695_v25  ;;  %v2002_v26 = vrot.slane %v1988_v36, %v3768_v29 }
 0x27b   :  { %3104 = vrot.lane.b32.xlu1 %v1940_v50, %s3717_s11 }
 0x27c   :  { %v2965_v35 = vpop.permute.xlu0 %2964 }
 0x27d   :  { %v3467_v47 = vsel %vm5527_vm6, %v3466_v32, %v2965_v35  ;;  %v2969_v53 = vpop.permute.xlu1 %2968  ;;  %vm5531_vm6 = vcmask 752640   ;;  %v2266_v35 = vrot.slane %v2252_v12, %v3768_v29 }
 0x27e   :  { %v3468_v17 = vsel %vm5528_vm9, %v3467_v47, %v2969_v53  ;;  %3228 = vrot.lane.b32.xlu0 %v2204_v51, %s3717_s11  ;;  %vm5532_vm9 = vcmask 785408   ;;  %v2006_v53 = vcombine.high %v2002_v26, %v3695_v25 }
 0x27f   :  { %3108 = vrot.lane.b32.xlu1 %v1979_v33, %s5391_s9  ;;  %v2270_v0 = vcombine.high %v2266_v35, %v3695_v25 }
 0x280   :  { %v2973_v52 = vpop.permute.xlu0 %2972 }
 0x281   :  { %v3469_v22 = vsel %vm5529_vm8, %v3468_v17, %v2973_v52  ;;  %v2977_v27 = vpop.permute.xlu1 %2976  ;;  %vm5533_vm8 = vcmask 818176  }
 0x282   :  { %v3470_v24 = vsel %vm5530_vm7, %v3469_v22, %v2977_v27  ;;  %3232 = vrot.lane.b32.xlu0 %v2243_v8, %s5391_s9  ;;  %vm5535_vm7 = vcmask 228352  }
 0x283   :  { %3112 = vrot.lane.b32.xlu1 %v2003_v13, %s3719_s13 }
 0x284   :  { %v2981_v18 = vpop.permute.xlu0 %2980 }
 0x285   :  { %v3471_v45 = vsel %vm5531_vm6, %v3470_v24, %v2981_v18  ;;  %v2985_v16 = vpop.permute.xlu1 %2984  ;;  %vm5536_vm6 = vcmask 261120  }
 0x286   :  { %v3472_v48 = vsel %vm5532_vm9, %v3471_v45, %v2985_v16  ;;  %3236 = vrot.lane.b32.xlu0 %v2267_v56, %s3719_s13  ;;  %vm5537_vm9 = vcmask 293888  }
 0x287   :  { %3116 = vrot.lane.b32.xlu1 %v1986_v20, %s3720_s14 }
 0x288   :  { %v2989_v30 = vpop.permute.xlu0 %2988 }
 0x289   :  { %v3473_v44 = vsel %vm5533_vm8, %v3472_v48, %v2989_v30  ;;  %v2993_v61 = vpop.permute.xlu1 %2992  ;;  %vm5538_vm8 = vcmask 326656  }
 0x28a   :  { %v3474_v38 = vsel %vm3313_vm13, %v3473_v44, %v2993_v61  ;;  %3240 = vrot.lane.b32.xlu0 %v2250_v43, %s3720_s14 }
 0x28b   :  { %3120 = vrot.lane.b32.xlu1 %v2004_v3, %s3721_s15 }
 0x28c   :  { %v2997_v39 = vpop.permute.xlu0 %2996 }
 0x28d   :  { %v3475_v4 = vsel %vm3315_vm14, %v3474_v38, %v2997_v39  ;;  %v3001_v28 = vpop.permute.xlu1 %3000 }
 0x28e   :  { %v3476_v6 = vsel %vm3317_vm12, %v3475_v4, %v3001_v28  ;;  %3244 = vrot.lane.b32.xlu0 %v2268_v41, %s3721_s15 }
 0x28f   :  { %3124 = vrot.lane.b32.xlu1 %v1995_v60, %s5372_s12 }
 0x290   :  { %v3005_v11 = vpop.permute.xlu0 %3004 }
 0x291   :  { %v3477_v10 = vsel %vm5352_vm10, %v3476_v6, %v3005_v11  ;;  %v3009_v40 = vpop.permute.xlu1 %3008  ;;  %vm5541_vm10 = vcmask 424960  }
 0x292   :  { %v3478_v49 = vsel %vm5351_vm15, %v3477_v10, %v3009_v40  ;;  %3248 = vrot.lane.b32.xlu0 %v2259_v58, %s5372_s12  ;;  %vm5540_vm15 = vcmask 392192  }
 0x293   :  { %3128 = vrot.lane.b32.xlu1 %v2005_v62, %s3723_s18 }
 0x294   :  { %v3013_v7 = vpop.permute.xlu0 %3012 }
 0x295   :  { %v5200_v63 = vsel %vm5350_vm11, %v3478_v49, %v3013_v7  ;;  %v3017_v23 = vpop.permute.xlu1 %3016  ;;  %vm5539_vm11 = vcmask 359424  }
 0x296   :  { %v3567_v50 = vcombine.low %v5066_v19, %v5200_v63  ;;  %3252 = vrot.lane.b32.xlu0 %v2269_v57, %s3723_s18  ;;  %v3480_v32 = vsel %vm3263_vm0, %v4936_v54, %v3017_v23 }
 0x297   :  { %3132 = vrot.lane.b32.xlu1 %v2002_v26, %s3724_s19 }
 0x298   :  { %v3021_v1 = vpop.permute.xlu0 %3020 }
 0x299   :  { %v3481_v51 = vsel %vm3265_vm1, %v3480_v32, %v3021_v1  ;;  %v3025_v47 = vpop.permute.xlu1 %3024 }
 0x29a   :  { %v3482_v33 = vsel %vm3267_vm2, %v3481_v51, %v3025_v47  ;;  %3256 = vrot.lane.b32.xlu0 %v2266_v35, %s3724_s19 }
 0x29b   :  { %3136 = vrot.lane.b32.xlu1 %v2006_v53, %s5534_s17 }
 0x29c   :  { %v3029_v17 = vpop.permute.xlu0 %3028 }
 0x29d   :  { %v3483_v52 = vsel %vm3269_vm3, %v3482_v33, %v3029_v17  ;;  %v3033_v54 = vpop.permute.xlu1 %3032 }
 0x29e   :  { %v3484_v8 = vsel %vm3271_vm4, %v3483_v52, %v3033_v54  ;;  %3260 = vrot.lane.b32.xlu0 %v2270_v0, %s5534_s17 }
 0x2a0   :  { %v3037_v29 = vpop.permute.xlu0 %3036 }
 0x2a1   :  { %v3485_v46 = vsel %vm3273_vm5, %v3484_v8, %v3037_v29  ;;  %v3041_v5 = vpop.permute.xlu1 %3040 }
 0x2a2   :  { %v3486_v22 = vsel %vm5535_vm7, %v3485_v46, %v3041_v5  ;;  %vm5542_vm7 = vcmask 457728  }
 0x2a4   :  { %v3045_v27 = vpop.permute.xlu0 %3044 }
 0x2a5   :  { %v3487_v13 = vsel %vm5536_vm6, %v3486_v22, %v3045_v27  ;;  %v3049_v24 = vpop.permute.xlu1 %3048 }
 0x2a6   :  { %v3488_v59 = vsel %vm5537_vm9, %v3487_v13, %v3049_v24 }
 0x2a8   :  { %v3053_v25 = vpop.permute.xlu0 %3052 }
 0x2a9   :  { %v3489_v14 = vsel %vm5538_vm8, %v3488_v59, %v3053_v25  ;;  %v3057_v37 = vpop.permute.xlu1 %3056 }
 0x2aa   :  { %v3490_v18 = vsel %vm5539_vm11, %v3489_v14, %v3057_v37  ;;  %vm5544_vm11 = vmmov %vm5536_vm6 }
 0x2ac   :  { %v3061_v56 = vpop.permute.xlu0 %3060 }
 0x2ad   :  { %v3491_v42 = vsel %vm5540_vm15, %v3490_v18, %v3061_v56  ;;  %v3065_v31 = vpop.permute.xlu1 %3064 }
 0x2ae   :  { %v3492_v45 = vsel %vm5541_vm10, %v3491_v42, %v3065_v31  ;;  %vm5543_vm10 = vcmask 228352  }
 0x2b0   :  { %v3069_v16 = vpop.permute.xlu0 %3068 }
 0x2b1   :  { %v3493_v20 = vsel %vm5542_vm7, %v3492_v45, %v3069_v16  ;;  %v3141_v48 = vpop.permute.xlu1 %3140 }
 0x2b2   :  { %v3511_v23 = vsel %vm3263_vm0, %v5001_v2, %v3141_v48  ;;  %vm5545_vm0 = vmmov %vm5537_vm9  ;;  %vm5553_vm9 = vcmask 523264  }
 0x2b4   :  { %v3145_v55 = vpop.permute.xlu0 %3144 }
 0x2b5   :  { %v3149_v34 = vpop.permute.xlu1 %3148  ;;  %v3512_v26 = vsel %vm3265_vm1, %v3511_v23, %v3145_v55  ;;  %vm5546_vm1 = vmmov %vm5538_vm8 }
 0x2b6   :  { %v3513_v35 = vsel %vm3267_vm2, %v3512_v26, %v3149_v34  ;;  %vm5547_vm2 = vcmask 359424   ;;  %vm5554_vm8 = vmmov %vm5553_vm9 }
 0x2b8   :  { %v3153_v30 = vpop.permute.xlu0 %3152 }
 0x2b9   :  { %v3157_v43 = vpop.permute.xlu1 %3156  ;;  %v3514_v51 = vsel %vm3269_vm3, %v3513_v35, %v3153_v30  ;;  %vm5548_vm3 = vmmov %vm5540_vm15  ;;  %vm5551_vm15 = vcmask 490496  }
 0x2ba   :  { %v3515_v33 = vsel %vm3271_vm4, %v3514_v51, %v3157_v43  ;;  %vm5549_vm4 = vcmask 424960   ;;  %vm5552_vm6 = vmmov %vm5551_vm15 }
 0x2bc   :  { %v3161_v9 = vpop.permute.xlu0 %3160 }
 0x2bd   :  { %v3165_v44 = vpop.permute.xlu1 %3164  ;;  %v3516_v17 = vsel %vm3273_vm5, %v3515_v33, %v3161_v9  ;;  %vm5550_vm5 = vmmov %vm5542_vm7  ;;  %vm5555_vm7 = vcmask 556032  }
 0x2be   :  { %v3517_v54 = vsel %vm5543_vm10, %v3516_v17, %v3165_v44  ;;  %vm5556_vm10 = vmmov %vm5555_vm7 }
 0x2c0   :  { %v3169_v61 = vpop.permute.xlu0 %3168 }
 0x2c1   :  { %v3173_v3 = vpop.permute.xlu1 %3172  ;;  %v3518_v2 = vsel %vm5544_vm11, %v3517_v54, %v3169_v61  ;;  %vm5557_vm11 = vcmask 588800  }
 0x2c2   :  { %v3519_v46 = vsel %vm5545_vm0, %v3518_v2, %v3173_v3  ;;  %vm5558_vm0 = vmmov %vm5557_vm11 }
 0x2c4   :  { %v3177_v38 = vpop.permute.xlu0 %3176 }
 0x2c5   :  { %v3181_v21 = vpop.permute.xlu1 %3180  ;;  %v3520_v5 = vsel %vm5546_vm1, %v3519_v46, %v3177_v38  ;;  %vm5559_vm1 = vcmask 621568  }
 0x2c6   :  { %v3521_v13 = vsel %vm5547_vm2, %v3520_v5, %v3181_v21  ;;  %vm5560_vm2 = vmmov %vm5559_vm1 }
 0x2c8   :  { %v3185_v39 = vpop.permute.xlu0 %3184 }
 0x2c9   :  { %v3189_v41 = vpop.permute.xlu1 %3188  ;;  %v3522_v24 = vsel %vm5548_vm3, %v3521_v13, %v3185_v39  ;;  %vm5561_vm3 = vcmask 654336  }
 0x2ca   :  { %v3523_v14 = vsel %vm5549_vm4, %v3522_v24, %v3189_v41  ;;  %vm5562_vm4 = vmmov %vm5561_vm3 }
 0x2cc   :  { %v3193_v4 = vpop.permute.xlu0 %3192 }
 0x2cd   :  { %v3073_v28 = vpop.permute.xlu1 %3072  ;;  %v3524_v37 = vsel %vm5550_vm5, %v3523_v14, %v3193_v4  ;;  %vm5563_vm5 = vcmask 687104  }
 0x2ce   :  { %v3494_v56 = vsel %vm5551_vm15, %v3493_v20, %v3073_v28  ;;  %vm5564_vm15 = vmmov %vm5563_vm5 }
 0x2d0   :  { %v3197_v60 = vpop.permute.xlu0 %3196 }
 0x2d1   :  { %v3077_v6 = vpop.permute.xlu1 %3076  ;;  %v3525_v42 = vsel %vm5552_vm6, %v3524_v37, %v3197_v60  ;;  %vm5565_vm6 = vcmask 719872  }
 0x2d2   :  { %v3495_v45 = vsel %vm5553_vm9, %v3494_v56, %v3077_v6  ;;  %vm5566_vm9 = vmmov %vm5565_vm6 }
 0x2d4   :  { %v3201_v11 = vpop.permute.xlu0 %3200 }
 0x2d5   :  { %v3081_v58 = vpop.permute.xlu1 %3080  ;;  %v3526_v16 = vsel %vm5554_vm8, %v3525_v42, %v3201_v11  ;;  %vm5567_vm8 = vcmask 752640  }
 0x2d6   :  { %v3496_v48 = vsel %vm5555_vm7, %v3495_v45, %v3081_v58  ;;  %vm5568_vm7 = vmmov %vm5567_vm8 }
 0x2d8   :  { %v3205_v36 = vpop.permute.xlu0 %3204 }
 0x2d9   :  { %v3085_v10 = vpop.permute.xlu1 %3084  ;;  %v3527_v55 = vsel %vm5556_vm10, %v3526_v16, %v3205_v36  ;;  %vm5569_vm10 = vcmask 785408  }
 0x2da   :  { %v3497_v34 = vsel %vm5557_vm11, %v3496_v48, %v3085_v10  ;;  %vm5570_vm11 = vmmov %vm5569_vm10 }
 0x2dc   :  { %v3209_v40 = vpop.permute.xlu0 %3208 }
 0x2dd   :  { %v3089_v62 = vpop.permute.xlu1 %3088  ;;  %v3528_v30 = vsel %vm5558_vm0, %v3527_v55, %v3209_v40  ;;  %vm5571_vm0 = vcmask 818176  }
 0x2de   :  { %v3498_v9 = vsel %vm5559_vm1, %v3497_v34, %v3089_v62  ;;  %vm5572_vm1 = vmmov %vm5571_vm0 }
 0x2e0   :  { %v3213_v49 = vpop.permute.xlu0 %3212 }
 0x2e1   :  { %v3093_v12 = vpop.permute.xlu1 %3092  ;;  %v3529_v20 = vsel %vm5560_vm2, %v3528_v30, %v3213_v49  ;;  %vm5573_vm2 = vcmask 949248  }
 0x2e2   :  { %v3499_v61 = vsel %vm5561_vm3, %v3498_v9, %v3093_v12  ;;  %vm5574_vm3 = vmmov %vm5573_vm2 }
 0x2e4   :  { %v3217_v7 = vpop.permute.xlu0 %3216 }
 0x2e5   :  { %v3097_v57 = vpop.permute.xlu1 %3096  ;;  %v3530_v3 = vsel %vm5562_vm4, %v3529_v20, %v3217_v7  ;;  %vm5575_vm4 = vcmask 982016  }
 0x2e6   :  { %v3500_v38 = vsel %vm5563_vm5, %v3499_v61, %v3097_v57  ;;  %vm5576_vm5 = vmmov %vm5575_vm4 }
 0x2e8   :  { %v3221_v32 = vpop.permute.xlu0 %3220 }
 0x2e9   :  { %v3101_v1 = vpop.permute.xlu1 %3100  ;;  %v3531_v21 = vsel %vm5564_vm15, %v3530_v3, %v3221_v32 }
 0x2ea   :  { %v3501_v39 = vsel %vm5565_vm6, %v3500_v38, %v3101_v1 }
 0x2ec   :  { %v3225_v47 = vpop.permute.xlu0 %3224 }
 0x2ed   :  { %v3105_v53 = vpop.permute.xlu1 %3104  ;;  %v3532_v41 = vsel %vm5566_vm9, %v3531_v21, %v3225_v47 }
 0x2ee   :  { %v3502_v28 = vsel %vm5567_vm8, %v3501_v39, %v3105_v53 }
 0x2f0   :  { %v3229_v0 = vpop.permute.xlu0 %3228 }
 0x2f1   :  { %v3109_v52 = vpop.permute.xlu1 %3108  ;;  %v3533_v60 = vsel %vm5568_vm7, %v3532_v41, %v3229_v0  ;;  %v3575_v0 = vrot.slane %v3567_v50, %v3754_v15 }
 0x2f2   :  { %v3503_v11 = vsel %vm5569_vm10, %v3502_v28, %v3109_v52 }
 0x2f4   :  { %v3233_v8 = vpop.permute.xlu0 %3232 }
 0x2f5   :  { %v3113_v29 = vpop.permute.xlu1 %3112  ;;  %v3534_v58 = vsel %vm5570_vm11, %v3533_v60, %v3233_v8 }
 0x2f6   :  { %v3504_v36 = vsel %vm5571_vm0, %v3503_v11, %v3113_v29 }
 0x2f8   :  { %v3237_v22 = vpop.permute.xlu0 %3236 }
 0x2f9   :  { %v3117_v27 = vpop.permute.xlu1 %3116  ;;  %v3535_v10 = vsel %vm5572_vm1, %v3534_v58, %v3237_v22 }
 0x2fa   :  { %v3505_v40 = vsel %vm3313_vm13, %v3504_v36, %v3117_v27 }
 0x2fc   :  { %v3241_v59 = vpop.permute.xlu0 %3240 }
 0x2fd   :  { %v3121_v25 = vpop.permute.xlu1 %3120  ;;  %v3536_v62 = vsel %vm3313_vm13, %v3535_v10, %v3241_v59  ;;  %vm5577_vm13 = vcmask 1014784  }
 0x2fe   :  { %v3506_v12 = vsel %vm3315_vm14, %v3505_v40, %v3121_v25  ;;  %vm5578_vm15 = vmmov %vm5577_vm13 }
 0x300   :  { %v3245_v18 = vpop.permute.xlu0 %3244 }
 0x301   :  { %v3125_v31 = vpop.permute.xlu1 %3124  ;;  %v3537_v7 = vsel %vm3315_vm14, %v3536_v62, %v3245_v18 }
 0x302   :  { %v3507_v57 = vsel %vm3317_vm12, %v3506_v12, %v3125_v31 }
 0x304   :  { %v3249_v43 = vpop.permute.xlu0 %3248 }
 0x305   :  { %v3129_v44 = vpop.permute.xlu1 %3128  ;;  %v3538_v23 = vsel %vm3317_vm12, %v3537_v7, %v3249_v43 }
 0x306   :  { %v3508_v32 = vsel %vm5573_vm2, %v3507_v57, %v3129_v44 }
 0x308   :  { %v3253_v4 = vpop.permute.xlu0 %3252 }
 0x309   :  { %v3133_v6 = vpop.permute.xlu1 %3132  ;;  %v3539_v1 = vsel %vm5574_vm3, %v3538_v23, %v3253_v4 }
 0x30a   :  { %v3509_v35 = vsel %vm5575_vm4, %v3508_v32, %v3133_v6 }
 0x30c   :  { %v3257_v49 = vpop.permute.xlu0 %3256 }
 0x30d   :  { %v3137_v26 = vpop.permute.xlu1 %3136  ;;  %v3540_v51 = vsel %vm5576_vm5, %v3539_v1, %v3257_v49 }
 0x30e   :  { %v3510_v53 = vsel %vm5577_vm13, %v3509_v35, %v3137_v26 }
 0x310   :  { %v3261_v47 = vpop.permute.xlu0 %3260 }
 0x311   :  { %v3541_v33 = vsel %vm5578_vm15, %v3540_v51, %v3261_v47 }
 0x312   :  { %v3568_v17 = vcombine.low %v3510_v53, %v3541_v33 }
 0x314   :  { %v3582_v52 = vrot.slane %v3568_v17, %v3754_v15 }
 0x316   :  { %v3583_v54 = vcombine.low %v3575_v0, %v3582_v52 }
 0x318   :  { %3587 = vst [vmem:[#allocation5 + $0x8] sm:$0xff] %v3583_v54 }
 0x319   :  { %3675 = shalt.err (!%p3672_p12)
}
 0x31a   :  { %s3676_s24 = scalar_lea.hbm %s5295_s1, 256 }
 0x31b   :  { %p3677_p13 = scmp.ne.s32.totalorder %s5295_s1, %s3676_s24  ;;  %p3680_p0 = scmp.lt.u32.totalorder %s3676_s24, %s5295_s1 }
 0x31d   :  { %p3682_p1 = pnand %p3680_p0, %p3677_p13 }
 0x31f   :  { %3685 = shalt.err (!%p3682_p1)
}
 0x320   :  { %3597 = dma.vmem_to_hbm [thread:$0]  %s3595_s20, 256, %s5295_s1, [#allocation4]  }
 0x321   :  { %3688 = dma.done.wait [#allocation4], 256  }
 0x322   :  { %3689 = vsyncadd [#allocation4], 4294967040 }
 0x323   :  { %3601 = vsyncpa [#allocation3], 1 }
 0x324   :  { %3602 = vsyncpa [#allocation4], 1 }

// kernel: tpu_custom_call.1
= control target key start
LH: loop header
LB: loop body
LE: loop exit
PB: predicated region body
PF: predicated region fallthrough
CT: control target
= control target key end

     0   :  { %6 = vsyncpa [#allocation3], 0  ;;  %s258_s6 = smov [#allocation2]   ;;  %s539_s0 = inlined_call_operand.hbm [shape: f32[1,2,4,256], index: 0, kind: input, shape index: {}]   ;;  %s540_s1 = inlined_call_operand.vmem [shape: f32[1,2,256,4], index: 1, kind: output, shape index: {}]  }
   0x1   :  { %s12_s7 = sshll.u32 %s258_s6, 4  ;;  %s234_s10 = scalar_lea.hbm %s539_s0, 256  ;;  %s13_s7 = int_to_ptr.vmem [resolvable:$true] %s12_s7 }
   0x2   :  { %p235_p0 = scmp.ne.s32.totalorder %s539_s0, %s234_s10  ;;  %p238_p1 = scmp.lt.u32.totalorder %s234_s10, %s539_s0 }
   0x4   :  { %p240_p2 = pnand %p238_p1, %p235_p0 }
   0x6   :  { %243 = shalt.err (!%p240_p2)
}
   0x7   :  { %s244_s15 = scalar_lea.vmem %s13_s7, 256  ;;  %p249_p4 = scmp.lt.s32.totalorder %s13_s7, %s13_s7 }
   0x8   :  { %p245_p3 = scmp.ne.s32.totalorder %s13_s7, %s244_s15  ;;  %p250_p5 = scmp.lt.s32.totalorder %s244_s15, %s244_s15 }
   0xa   :  { %p251_p6 = por %p250_p5, %p249_p4 }
   0xc   :  { %p252_p7 = pnand %p251_p6, %p245_p3 }
   0xe   :  { %255 = shalt.err (!%p252_p7)
}
   0xf   :  { %s259_s16 = smov 128   ;;  %s260_s17 = smov 8  }
  0x10   :  { %18 = dma.hbm_to_vmem [thread:$0]  %s539_s0, 256, %s13_s7, [#allocation3], %s259_s16, %s259_s16, %s260_s17  }
  0x11   :  { %256 = dma.done.wait [#allocation3], 256  }
  0x12   :  { %257 = vsyncadd [#allocation3], 4294967040  ;;  %v23_v0 = vld [vmem:[#allocation2 + $0x8] sm:$0xff]  ;;  %v22_v1 = vld [vmem:[#allocation2] sm:$0xff]  ;;  %vm158_vm0 = vcmask 31744  }
  0x13   :  { %94 = vxpose.xlu1.b32.start.end [1/1] (short) %v23_v0, 128  ;;  %30 = vxpose.xlu0.b32.start.end [1/1] (short) %v22_v1, 128  ;;  %v27_v2 = vcombine.high %v23_v0, %v23_v0  ;;  %v26_v3 = vcombine.high %v22_v1, %v22_v1 }
  0x50   :  { %126 = vxpose.xlu1.b32.start.end [1/1] (short) %v27_v2, 128  ;;  %62 = vxpose.xlu0.b32.start.end [1/1] (short) %v26_v3, 128 }
  0x93   :  { %v110_v4 = vpop.trf.xlu1  ;;  %v46_v5 = vpop.trf.xlu0 }
  0x94   :  { %191 = vst.msk [vmem:[%s540_s1 + $0x100] sm:$0xff] %vm158_vm0, %v110_v4  ;;  %159 = vst.msk [vmem:[%s540_s1] sm:$0xff] %vm158_vm0, %v46_v5 }
  0x97   :  { %v111_v6 = vpop.trf.xlu1  ;;  %v47_v7 = vpop.trf.xlu0 }
  0x98   :  { %192 = vst.msk [vmem:[%s540_s1 + $0x108] sm:$0xff] %vm158_vm0, %v111_v6  ;;  %160 = vst.msk [vmem:[%s540_s1 + $0x8] sm:$0xff] %vm158_vm0, %v47_v7 }
  0x9b   :  { %v112_v8 = vpop.trf.xlu1  ;;  %v48_v9 = vpop.trf.xlu0 }
  0x9c   :  { %193 = vst.msk [vmem:[%s540_s1 + $0x110] sm:$0xff] %vm158_vm0, %v112_v8  ;;  %161 = vst.msk [vmem:[%s540_s1 + $0x10] sm:$0xff] %vm158_vm0, %v48_v9 }
  0x9f   :  { %v113_v10 = vpop.trf.xlu1  ;;  %v49_v11 = vpop.trf.xlu0 }
  0xa0   :  { %194 = vst.msk [vmem:[%s540_s1 + $0x118] sm:$0xff] %vm158_vm0, %v113_v10  ;;  %162 = vst.msk [vmem:[%s540_s1 + $0x18] sm:$0xff] %vm158_vm0, %v49_v11 }
  0xa3   :  { %v114_v12 = vpop.trf.xlu1  ;;  %v50_v13 = vpop.trf.xlu0 }
  0xa4   :  { %195 = vst.msk [vmem:[%s540_s1 + $0x120] sm:$0xff] %vm158_vm0, %v114_v12  ;;  %163 = vst.msk [vmem:[%s540_s1 + $0x20] sm:$0xff] %vm158_vm0, %v50_v13 }
  0xa7   :  { %v115_v14 = vpop.trf.xlu1  ;;  %v51_v15 = vpop.trf.xlu0 }
  0xa8   :  { %196 = vst.msk [vmem:[%s540_s1 + $0x128] sm:$0xff] %vm158_vm0, %v115_v14  ;;  %164 = vst.msk [vmem:[%s540_s1 + $0x28] sm:$0xff] %vm158_vm0, %v51_v15 }
  0xab   :  { %v116_v16 = vpop.trf.xlu1  ;;  %v52_v17 = vpop.trf.xlu0 }
  0xac   :  { %197 = vst.msk [vmem:[%s540_s1 + $0x130] sm:$0xff] %vm158_vm0, %v116_v16  ;;  %165 = vst.msk [vmem:[%s540_s1 + $0x30] sm:$0xff] %vm158_vm0, %v52_v17 }
  0xaf   :  { %v117_v18 = vpop.trf.xlu1  ;;  %v53_v19 = vpop.trf.xlu0 }
  0xb0   :  { %198 = vst.msk [vmem:[%s540_s1 + $0x138] sm:$0xff] %vm158_vm0, %v117_v18  ;;  %166 = vst.msk [vmem:[%s540_s1 + $0x38] sm:$0xff] %vm158_vm0, %v53_v19 }
  0xb3   :  { %v118_v20 = vpop.trf.xlu1  ;;  %v54_v21 = vpop.trf.xlu0 }
  0xb4   :  { %199 = vst.msk [vmem:[%s540_s1 + $0x140] sm:$0xff] %vm158_vm0, %v118_v20  ;;  %167 = vst.msk [vmem:[%s540_s1 + $0x40] sm:$0xff] %vm158_vm0, %v54_v21 }
  0xb7   :  { %v119_v22 = vpop.trf.xlu1  ;;  %v55_v23 = vpop.trf.xlu0 }
  0xb8   :  { %200 = vst.msk [vmem:[%s540_s1 + $0x148] sm:$0xff] %vm158_vm0, %v119_v22  ;;  %168 = vst.msk [vmem:[%s540_s1 + $0x48] sm:$0xff] %vm158_vm0, %v55_v23 }
  0xbb   :  { %v120_v24 = vpop.trf.xlu1  ;;  %v56_v25 = vpop.trf.xlu0 }
  0xbc   :  { %201 = vst.msk [vmem:[%s540_s1 + $0x150] sm:$0xff] %vm158_vm0, %v120_v24  ;;  %169 = vst.msk [vmem:[%s540_s1 + $0x50] sm:$0xff] %vm158_vm0, %v56_v25 }
  0xbf   :  { %v121_v26 = vpop.trf.xlu1  ;;  %v57_v27 = vpop.trf.xlu0 }
  0xc0   :  { %202 = vst.msk [vmem:[%s540_s1 + $0x158] sm:$0xff] %vm158_vm0, %v121_v26  ;;  %170 = vst.msk [vmem:[%s540_s1 + $0x58] sm:$0xff] %vm158_vm0, %v57_v27 }
  0xc3   :  { %v122_v28 = vpop.trf.xlu1  ;;  %v58_v29 = vpop.trf.xlu0 }
  0xc4   :  { %203 = vst.msk [vmem:[%s540_s1 + $0x160] sm:$0xff] %vm158_vm0, %v122_v28  ;;  %171 = vst.msk [vmem:[%s540_s1 + $0x60] sm:$0xff] %vm158_vm0, %v58_v29 }
  0xc7   :  { %v123_v30 = vpop.trf.xlu1  ;;  %v59_v31 = vpop.trf.xlu0 }
  0xc8   :  { %204 = vst.msk [vmem:[%s540_s1 + $0x168] sm:$0xff] %vm158_vm0, %v123_v30  ;;  %172 = vst.msk [vmem:[%s540_s1 + $0x68] sm:$0xff] %vm158_vm0, %v59_v31 }
  0xcb   :  { %v124_v32 = vpop.trf.xlu1  ;;  %v60_v33 = vpop.trf.xlu0 }
  0xcc   :  { %205 = vst.msk [vmem:[%s540_s1 + $0x170] sm:$0xff] %vm158_vm0, %v124_v32  ;;  %173 = vst.msk [vmem:[%s540_s1 + $0x70] sm:$0xff] %vm158_vm0, %v60_v33 }
  0xcf   :  { %v125_v34 = vpop.trf.xlu1  ;;  %v61_v35 = vpop.trf.xlu0 }
  0xd0   :  { %206 = vst.msk [vmem:[%s540_s1 + $0x178] sm:$0xff] %vm158_vm0, %v125_v34  ;;  %174 = vst.msk [vmem:[%s540_s1 + $0x78] sm:$0xff] %vm158_vm0, %v61_v35 }
  0xd3   :  { %v142_v36 = vpop.trf.xlu1  ;;  %v78_v37 = vpop.trf.xlu0 }
  0xd4   :  { %207 = vst.msk [vmem:[%s540_s1 + $0x180] sm:$0xff] %vm158_vm0, %v142_v36  ;;  %175 = vst.msk [vmem:[%s540_s1 + $0x80] sm:$0xff] %vm158_vm0, %v78_v37 }
  0xd7   :  { %v143_v38 = vpop.trf.xlu1  ;;  %v79_v39 = vpop.trf.xlu0 }
  0xd8   :  { %208 = vst.msk [vmem:[%s540_s1 + $0x188] sm:$0xff] %vm158_vm0, %v143_v38  ;;  %176 = vst.msk [vmem:[%s540_s1 + $0x88] sm:$0xff] %vm158_vm0, %v79_v39 }
  0xdb   :  { %v144_v40 = vpop.trf.xlu1  ;;  %v80_v41 = vpop.trf.xlu0 }
  0xdc   :  { %209 = vst.msk [vmem:[%s540_s1 + $0x190] sm:$0xff] %vm158_vm0, %v144_v40  ;;  %177 = vst.msk [vmem:[%s540_s1 + $0x90] sm:$0xff] %vm158_vm0, %v80_v41 }
  0xdf   :  { %v145_v42 = vpop.trf.xlu1  ;;  %v81_v43 = vpop.trf.xlu0 }
  0xe0   :  { %210 = vst.msk [vmem:[%s540_s1 + $0x198] sm:$0xff] %vm158_vm0, %v145_v42  ;;  %178 = vst.msk [vmem:[%s540_s1 + $0x98] sm:$0xff] %vm158_vm0, %v81_v43 }
  0xe3   :  { %v146_v44 = vpop.trf.xlu1  ;;  %v82_v45 = vpop.trf.xlu0 }
  0xe4   :  { %211 = vst.msk [vmem:[%s540_s1 + $0x1a0] sm:$0xff] %vm158_vm0, %v146_v44  ;;  %179 = vst.msk [vmem:[%s540_s1 + $0xa0] sm:$0xff] %vm158_vm0, %v82_v45 }
  0xe7   :  { %v147_v46 = vpop.trf.xlu1  ;;  %v83_v47 = vpop.trf.xlu0 }
  0xe8   :  { %212 = vst.msk [vmem:[%s540_s1 + $0x1a8] sm:$0xff] %vm158_vm0, %v147_v46  ;;  %180 = vst.msk [vmem:[%s540_s1 + $0xa8] sm:$0xff] %vm158_vm0, %v83_v47 }
  0xeb   :  { %v148_v48 = vpop.trf.xlu1  ;;  %v84_v49 = vpop.trf.xlu0 }
  0xec   :  { %213 = vst.msk [vmem:[%s540_s1 + $0x1b0] sm:$0xff] %vm158_vm0, %v148_v48  ;;  %181 = vst.msk [vmem:[%s540_s1 + $0xb0] sm:$0xff] %vm158_vm0, %v84_v49 }
  0xef   :  { %v149_v50 = vpop.trf.xlu1  ;;  %v85_v51 = vpop.trf.xlu0 }
  0xf0   :  { %214 = vst.msk [vmem:[%s540_s1 + $0x1b8] sm:$0xff] %vm158_vm0, %v149_v50  ;;  %182 = vst.msk [vmem:[%s540_s1 + $0xb8] sm:$0xff] %vm158_vm0, %v85_v51 }
  0xf3   :  { %v150_v52 = vpop.trf.xlu1  ;;  %v86_v53 = vpop.trf.xlu0 }
  0xf4   :  { %215 = vst.msk [vmem:[%s540_s1 + $0x1c0] sm:$0xff] %vm158_vm0, %v150_v52  ;;  %183 = vst.msk [vmem:[%s540_s1 + $0xc0] sm:$0xff] %vm158_vm0, %v86_v53 }
  0xf7   :  { %v151_v54 = vpop.trf.xlu1  ;;  %v87_v55 = vpop.trf.xlu0 }
  0xf8   :  { %216 = vst.msk [vmem:[%s540_s1 + $0x1c8] sm:$0xff] %vm158_vm0, %v151_v54  ;;  %184 = vst.msk [vmem:[%s540_s1 + $0xc8] sm:$0xff] %vm158_vm0, %v87_v55 }
  0xfb   :  { %v152_v56 = vpop.trf.xlu1  ;;  %v88_v57 = vpop.trf.xlu0 }
  0xfc   :  { %217 = vst.msk [vmem:[%s540_s1 + $0x1d0] sm:$0xff] %vm158_vm0, %v152_v56  ;;  %185 = vst.msk [vmem:[%s540_s1 + $0xd0] sm:$0xff] %vm158_vm0, %v88_v57 }
  0xff   :  { %v153_v58 = vpop.trf.xlu1  ;;  %v89_v59 = vpop.trf.xlu0 }
 0x100   :  { %218 = vst.msk [vmem:[%s540_s1 + $0x1d8] sm:$0xff] %vm158_vm0, %v153_v58  ;;  %186 = vst.msk [vmem:[%s540_s1 + $0xd8] sm:$0xff] %vm158_vm0, %v89_v59 }
 0x103   :  { %v154_v60 = vpop.trf.xlu1  ;;  %v90_v61 = vpop.trf.xlu0 }
 0x104   :  { %219 = vst.msk [vmem:[%s540_s1 + $0x1e0] sm:$0xff] %vm158_vm0, %v154_v60  ;;  %187 = vst.msk [vmem:[%s540_s1 + $0xe0] sm:$0xff] %vm158_vm0, %v90_v61 }
 0x107   :  { %v155_v62 = vpop.trf.xlu1  ;;  %v91_v63 = vpop.trf.xlu0 }
 0x108   :  { %220 = vst.msk [vmem:[%s540_s1 + $0x1e8] sm:$0xff] %vm158_vm0, %v155_v62  ;;  %188 = vst.msk [vmem:[%s540_s1 + $0xe8] sm:$0xff] %vm158_vm0, %v91_v63 }
 0x10b   :  { %v156_v0 = vpop.trf.xlu1  ;;  %v92_v1 = vpop.trf.xlu0 }
 0x10c   :  { %221 = vst.msk [vmem:[%s540_s1 + $0x1f0] sm:$0xff] %vm158_vm0, %v156_v0  ;;  %189 = vst.msk [vmem:[%s540_s1 + $0xf0] sm:$0xff] %vm158_vm0, %v92_v1 }
 0x10f   :  { %v157_v2 = vpop.trf.xlu1  ;;  %v93_v3 = vpop.trf.xlu0 }
 0x110   :  { %222 = vst.msk [vmem:[%s540_s1 + $0x1f8] sm:$0xff] %vm158_vm0, %v157_v2  ;;  %190 = vst.msk [vmem:[%s540_s1 + $0xf8] sm:$0xff] %vm158_vm0, %v93_v3 }
 0x111   :  { %227 = vsyncpa [#allocation3], 1 }

</bundles_post_ra>
